<compile_context>
chip_gen: v6e
topology: v6e:2x2x1
jax: 0.10.0
libtpu: 0.0.40
codegen_flags: <defaults>
</compile_context>

<pallas_src>
import jax
import jax.numpy as jnp
from jax.experimental import pallas as pl
from jax.experimental.pallas import tpu as pltpu


def _make_upsample_conv_kernel(H, W, Cin, Cout):
    """Kernel for one batch element: shared 3x3 im2col + one phase-fused matmul."""

    def kernel(x_ref, w_ref, b_ref, o_ref, col_ref):
        # x_ref:   (1, H+2, W+2, Cin)   zero-padded low-res input (compute dtype)
        # w_ref:   (9*Cin, 4*Cout)      phase-folded weights, taps along K, phases along N
        # b_ref:   (1, 4*Cout) f32      bias, repeated per phase
        # o_ref:   (1, H*W, 4*Cout)     output (f32), lane-dense
        # col_ref: (H*W, 9*Cin)         VMEM im2col scratch (compute dtype)

        # Shared im2col: the 9 shifted (H, W) windows of the padded low-res tile,
        # stacked along K.  Tap t = dy*3 + dx reads padded coords (i+dy, j+dx).
        for dy in range(3):
            for dx in range(3):
                t = dy * 3 + dx
                win = x_ref[0, pl.ds(dy, H), pl.ds(dx, W), :]          # (H, W, Cin)
                col_ref[:, t * Cin:(t + 1) * Cin] = (
                    win.reshape(H * W, Cin).astype(col_ref.dtype)
                )

        # One MXU matmul for all four output phases, f32 accumulate.
        acc = jnp.dot(col_ref[...], w_ref[...], preferred_element_type=jnp.float32)
        acc = acc + b_ref[...]                                         # (H*W, 4*Cout)

        o_ref[...] = acc.reshape(1, H * W, 4 * Cout).astype(o_ref.dtype)

    return kernel


# For output-row parity a (resp. column parity b), kernel rows ky of the 3x3 conv
# collapse onto low-res offset dy in {0,1,2} (padded coords) as follows:
#   a=0: dy=0 <- {ky=0}, dy=1 <- {ky=1,2}, dy=2 <- {}
#   a=1: dy=0 <- {},     dy=1 <- {ky=0,1}, dy=2 <- {ky=2}
_FOLD_SETS = (((0,), (1, 2), ()), ((), (0, 1), (2,)))


def _fold_upsample_conv_weights(weight_oihw, dtype):
    """(Cout, Cin, 3, 3) -> (9*Cin, 4*Cout) phase-fused weights.

    Row index  k = (dy*3 + dx)*Cin + c   (matches the im2col layout in the kernel).
    Col index  q = (2a + b)*Cout + co    (phase-major, then output channel).
    """
    Cout, Cin = weight_oihw.shape[0], weight_oihw.shape[1]
    w = jnp.transpose(weight_oihw, (2, 3, 1, 0)).astype(jnp.float32)   # (3, 3, Cin, Cout)

    phase_cols = []
    for a in range(2):
        for b in range(2):
            taps = []
            for dy in range(3):
                for dx in range(3):
                    wsum = jnp.zeros((Cin, Cout), jnp.float32)
                    for ky in _FOLD_SETS[a][dy]:
                        for kx in _FOLD_SETS[b][dx]:
                            wsum = wsum + w[ky, kx]
                    taps.append(wsum)                                  # (Cin, Cout)
            phase_cols.append(jnp.concatenate(taps, axis=0))           # (9*Cin, Cout)
    return jnp.concatenate(phase_cols, axis=1).astype(dtype)           # (9*Cin, 4*Cout)


def upsample_forward(x_nchw, weight_oihw=None, bias=None, use_conv=True,
                     compute_dtype=jnp.bfloat16):
    """Equivalent of Upsample(channels, use_conv, dims=2).forward for NCHW input."""
    N, C, H, W = x_nchw.shape

    if not use_conv:
        # nearest-neighbor 2x upsample only
        return jnp.repeat(jnp.repeat(x_nchw, 2, axis=2), 2, axis=3)

    Cout = weight_oihw.shape[0]

    # Layout glue on the LOW-RES tensor only (1/4 of the output size): NCHW -> NHWC + pad 1.
    x = jnp.transpose(x_nchw, (0, 2, 3, 1))                            # (N, H, W, C)
    x_pad = jnp.pad(x, ((0, 0), (1, 1), (1, 1), (0, 0))).astype(compute_dtype)

    wf = _fold_upsample_conv_weights(weight_oihw, compute_dtype)       # (9C, 4*Cout)
    b4 = jnp.tile(bias.reshape(1, Cout).astype(jnp.float32), (1, 4))   # (1, 4*Cout)

    out3 = pl.pallas_call(
        _make_upsample_conv_kernel(H, W, C, Cout),
        out_shape=jax.ShapeDtypeStruct((N, H * W, 4 * Cout), jnp.float32),
        grid=(N,),
        in_specs=[
            pl.BlockSpec((1, H + 2, W + 2, C), lambda n: (n, 0, 0, 0)),
            pl.BlockSpec((9 * C, 4 * Cout), lambda n: (0, 0)),
            pl.BlockSpec((1, 4 * Cout), lambda n: (0, 0)),
        ],
        out_specs=pl.BlockSpec((1, H * W, 4 * Cout), lambda n: (n, 0, 0)),
        scratch_shapes=[pltpu.VMEM((H * W, 9 * C), compute_dtype)],
        compiler_params=pltpu.CompilerParams(
            dimension_semantics=("parallel",)
        ),
    )(x_pad, wf, b4)

    # (n, i*W+j, (2a+b)*Cout+co) -> (n, co, 2i+a, 2j+b): single XLA relayout at the
    # NCHW module boundary (would vanish in an NHWC end-to-end model).
    y = out3.reshape(N, H, W, 2, 2, Cout)
    y = jnp.transpose(y, (0, 5, 1, 3, 2, 4)).reshape(N, Cout, 2 * H, 2 * W)
    return y


def _reference_forward(x_nchw, weight_oihw, bias):
    """Pure-JAX reference (nearest 2x upsample + conv2d, padding=1) in NCHW, f32."""
    x = jnp.repeat(jnp.repeat(x_nchw, 2, axis=2), 2, axis=3)
    y = jax.lax.conv_general_dilated(
        x, weight_oihw,
        window_strides=(1, 1), padding=((1, 1), (1, 1)),
        dimension_numbers=("NCHW", "OIHW", "NCHW"),
    )
    return y + bias.reshape(1, -1, 1, 1)


if __name__ == "__main__":
    key = jax.random.PRNGKey(0)
    kx, kw, kb = jax.random.split(key, 3)

    # Module config: Upsample(channels=4, use_conv=True, dims=2, out_channels=None)
    N, C, H, W = 2, 4, 16, 16
    Cout = C
    x = jax.random.normal(kx, (N, C, H, W), dtype=jnp.float32)

    # PyTorch Conv2d-style init: weight (Cout, Cin, 3, 3), bias (Cout,)
    fan_in = C * 3 * 3
    bound = 1.0 / (fan_in ** 0.5)
    weight = jax.random.uniform(kw, (Cout, C, 3, 3), jnp.float32, -bound, bound)
    bias = jax.random.uniform(kb, (Cout,), jnp.float32, -bound, bound)

    y_ref = _reference_forward(x, weight, bias)

    # 1) f32 compute path: tight check that the phase-fused algorithm is exact.
    y32 = jax.block_until_ready(
        upsample_forward(x, weight, bias, use_conv=True, compute_dtype=jnp.float32)
    )
    assert y32.shape == (N, Cout, 2 * H, 2 * W), y32.shape
    assert jnp.allclose(y32, y_ref, atol=1e-4, rtol=1e-4), float(
        jnp.max(jnp.abs(y32 - y_ref))
    )

    # 2) bf16 compute path (production default): f32 accumulate, relaxed tolerance.
    ybf = jax.block_until_ready(
        upsample_forward(x, weight, bias, use_conv=True, compute_dtype=jnp.bfloat16)
    )
    assert ybf.shape == (N, Cout, 2 * H, 2 * W), ybf.shape
    assert jnp.allclose(ybf, y_ref, atol=1e-1, rtol=1e-2), float(
        jnp.max(jnp.abs(ybf - y_ref))
    )

    print("KERNEL_OK")
</pallas_src>

<mosaic_0001>
module attributes {stable_mosaic.version = 11 : i64} {
  func.func @kernel(%arg0: i32, %arg1: memref<1x18x18x4xf32, #tpu.memory_space<vmem>>, %arg2: memref<36x16xf32, #tpu.memory_space<vmem>>, %arg3: memref<1x16xf32, #tpu.memory_space<vmem>>, %arg4: memref<1x256x16xf32, #tpu.memory_space<vmem>>, %arg5: memref<256x36xf32, #tpu.memory_space<vmem>>) attributes {dimension_semantics = [#tpu.dimension_semantics<parallel>], iteration_bounds = array<i64: 2>, scalar_prefetch = 0 : i64, scratch_operands = 1 : i64, tpu.core_type = #tpu.core_type<tc>, window_params = [{transform_indices = @transform_0, window_bounds = array<i64: 1, 18, 18, 4>}, {pipeline_mode = #tpu.pipeline_mode<synchronous>, transform_indices = @transform_1, window_bounds = array<i64: 36, 16>}, {pipeline_mode = #tpu.pipeline_mode<synchronous>, transform_indices = @transform_2, window_bounds = array<i64: 1, 16>}, {transform_indices = @transform_3, window_bounds = array<i64: 1, 256, 16>}]} {
    %c0 = arith.constant 0 : index
    %c0_0 = arith.constant 0 : index
    %c0_1 = arith.constant 0 : index
    %c0_2 = arith.constant 0 : index
    %0 = vector.load %arg1[%c0, %c0_0, %c0_1, %c0_2] : memref<1x18x18x4xf32, #tpu.memory_space<vmem>>, vector<1x16x16x4xf32>
    %1 = vector.shape_cast %0 : vector<1x16x16x4xf32> to vector<16x16x4xf32>
    %2 = vector.shape_cast %1 : vector<16x16x4xf32> to vector<256x4xf32>
    %c0_3 = arith.constant 0 : index
    %c0_4 = arith.constant 0 : index
    %3 = vector.load %arg5[%c0_3, %c0_4] : memref<256x36xf32, #tpu.memory_space<vmem>>, vector<256x4xf32>
    tpu.vector_store %arg5[%c0_3, %c0_4], %2 {strides = array<i32>} : memref<256x36xf32, #tpu.memory_space<vmem>>, vector<256x4xf32>,
    %c0_5 = arith.constant 0 : index
    %c0_6 = arith.constant 0 : index
    %c1 = arith.constant 1 : index
    %c0_7 = arith.constant 0 : index
    %4 = vector.load %arg1[%c0_5, %c0_6, %c1, %c0_7] : memref<1x18x18x4xf32, #tpu.memory_space<vmem>>, vector<1x16x16x4xf32>
    %5 = vector.shape_cast %4 : vector<1x16x16x4xf32> to vector<16x16x4xf32>
    %6 = vector.shape_cast %5 : vector<16x16x4xf32> to vector<256x4xf32>
    %c0_8 = arith.constant 0 : index
    %c4 = arith.constant 4 : index
    %7 = vector.load %arg5[%c0_8, %c4] : memref<256x36xf32, #tpu.memory_space<vmem>>, vector<256x4xf32>
    tpu.vector_store %arg5[%c0_8, %c4], %6 {strides = array<i32>} : memref<256x36xf32, #tpu.memory_space<vmem>>, vector<256x4xf32>,
    %c0_9 = arith.constant 0 : index
    %c0_10 = arith.constant 0 : index
    %c2 = arith.constant 2 : index
    %c0_11 = arith.constant 0 : index
    %8 = vector.load %arg1[%c0_9, %c0_10, %c2, %c0_11] : memref<1x18x18x4xf32, #tpu.memory_space<vmem>>, vector<1x16x16x4xf32>
    %9 = vector.shape_cast %8 : vector<1x16x16x4xf32> to vector<16x16x4xf32>
    %10 = vector.shape_cast %9 : vector<16x16x4xf32> to vector<256x4xf32>
    %c0_12 = arith.constant 0 : index
    %c8 = arith.constant 8 : index
    %11 = vector.load %arg5[%c0_12, %c8] : memref<256x36xf32, #tpu.memory_space<vmem>>, vector<256x4xf32>
    tpu.vector_store %arg5[%c0_12, %c8], %10 {strides = array<i32>} : memref<256x36xf32, #tpu.memory_space<vmem>>, vector<256x4xf32>,
    %c0_13 = arith.constant 0 : index
    %c1_14 = arith.constant 1 : index
    %c0_15 = arith.constant 0 : index
    %c0_16 = arith.constant 0 : index
    %12 = vector.load %arg1[%c0_13, %c1_14, %c0_15, %c0_16] : memref<1x18x18x4xf32, #tpu.memory_space<vmem>>, vector<1x16x16x4xf32>
    %13 = vector.shape_cast %12 : vector<1x16x16x4xf32> to vector<16x16x4xf32>
    %14 = vector.shape_cast %13 : vector<16x16x4xf32> to vector<256x4xf32>
    %c0_17 = arith.constant 0 : index
    %c12 = arith.constant 12 : index
    %15 = vector.load %arg5[%c0_17, %c12] : memref<256x36xf32, #tpu.memory_space<vmem>>, vector<256x4xf32>
    tpu.vector_store %arg5[%c0_17, %c12], %14 {strides = array<i32>} : memref<256x36xf32, #tpu.memory_space<vmem>>, vector<256x4xf32>,
    %c0_18 = arith.constant 0 : index
    %c1_19 = arith.constant 1 : index
    %c1_20 = arith.constant 1 : index
    %c0_21 = arith.constant 0 : index
    %16 = vector.load %arg1[%c0_18, %c1_19, %c1_20, %c0_21] : memref<1x18x18x4xf32, #tpu.memory_space<vmem>>, vector<1x16x16x4xf32>
    %17 = vector.shape_cast %16 : vector<1x16x16x4xf32> to vector<16x16x4xf32>
    %18 = vector.shape_cast %17 : vector<16x16x4xf32> to vector<256x4xf32>
    %c0_22 = arith.constant 0 : index
    %c16 = arith.constant 16 : index
    %19 = vector.load %arg5[%c0_22, %c16] : memref<256x36xf32, #tpu.memory_space<vmem>>, vector<256x4xf32>
    tpu.vector_store %arg5[%c0_22, %c16], %18 {strides = array<i32>} : memref<256x36xf32, #tpu.memory_space<vmem>>, vector<256x4xf32>,
    %c0_23 = arith.constant 0 : index
    %c1_24 = arith.constant 1 : index
    %c2_25 = arith.constant 2 : index
    %c0_26 = arith.constant 0 : index
    %20 = vector.load %arg1[%c0_23, %c1_24, %c2_25, %c0_26] : memref<1x18x18x4xf32, #tpu.memory_space<vmem>>, vector<1x16x16x4xf32>
    %21 = vector.shape_cast %20 : vector<1x16x16x4xf32> to vector<16x16x4xf32>
    %22 = vector.shape_cast %21 : vector<16x16x4xf32> to vector<256x4xf32>
    %c0_27 = arith.constant 0 : index
    %c20 = arith.constant 20 : index
    %23 = vector.load %arg5[%c0_27, %c20] : memref<256x36xf32, #tpu.memory_space<vmem>>, vector<256x4xf32>
    tpu.vector_store %arg5[%c0_27, %c20], %22 {strides = array<i32>} : memref<256x36xf32, #tpu.memory_space<vmem>>, vector<256x4xf32>,
    %c0_28 = arith.constant 0 : index
    %c2_29 = arith.constant 2 : index
    %c0_30 = arith.constant 0 : index
    %c0_31 = arith.constant 0 : index
    %24 = vector.load %arg1[%c0_28, %c2_29, %c0_30, %c0_31] : memref<1x18x18x4xf32, #tpu.memory_space<vmem>>, vector<1x16x16x4xf32>
    %25 = vector.shape_cast %24 : vector<1x16x16x4xf32> to vector<16x16x4xf32>
    %26 = vector.shape_cast %25 : vector<16x16x4xf32> to vector<256x4xf32>
    %c0_32 = arith.constant 0 : index
    %c24 = arith.constant 24 : index
    %27 = vector.load %arg5[%c0_32, %c24] : memref<256x36xf32, #tpu.memory_space<vmem>>, vector<256x4xf32>
    tpu.vector_store %arg5[%c0_32, %c24], %26 {strides = array<i32>} : memref<256x36xf32, #tpu.memory_space<vmem>>, vector<256x4xf32>,
    %c0_33 = arith.constant 0 : index
    %c2_34 = arith.constant 2 : index
    %c1_35 = arith.constant 1 : index
    %c0_36 = arith.constant 0 : index
    %28 = vector.load %arg1[%c0_33, %c2_34, %c1_35, %c0_36] : memref<1x18x18x4xf32, #tpu.memory_space<vmem>>, vector<1x16x16x4xf32>
    %29 = vector.shape_cast %28 : vector<1x16x16x4xf32> to vector<16x16x4xf32>
    %30 = vector.shape_cast %29 : vector<16x16x4xf32> to vector<256x4xf32>
    %c0_37 = arith.constant 0 : index
    %c28 = arith.constant 28 : index
    %31 = vector.load %arg5[%c0_37, %c28] : memref<256x36xf32, #tpu.memory_space<vmem>>, vector<256x4xf32>
    tpu.vector_store %arg5[%c0_37, %c28], %30 {strides = array<i32>} : memref<256x36xf32, #tpu.memory_space<vmem>>, vector<256x4xf32>,
    %c0_38 = arith.constant 0 : index
    %c2_39 = arith.constant 2 : index
    %c2_40 = arith.constant 2 : index
    %c0_41 = arith.constant 0 : index
    %32 = vector.load %arg1[%c0_38, %c2_39, %c2_40, %c0_41] : memref<1x18x18x4xf32, #tpu.memory_space<vmem>>, vector<1x16x16x4xf32>
    %33 = vector.shape_cast %32 : vector<1x16x16x4xf32> to vector<16x16x4xf32>
    %34 = vector.shape_cast %33 : vector<16x16x4xf32> to vector<256x4xf32>
    %c0_42 = arith.constant 0 : index
    %c32 = arith.constant 32 : index
    %35 = vector.load %arg5[%c0_42, %c32] : memref<256x36xf32, #tpu.memory_space<vmem>>, vector<256x4xf32>
    tpu.vector_store %arg5[%c0_42, %c32], %34 {strides = array<i32>} : memref<256x36xf32, #tpu.memory_space<vmem>>, vector<256x4xf32>,
    %c0_43 = arith.constant 0 : index
    %c0_44 = arith.constant 0 : index
    %36 = vector.load %arg5[%c0_43, %c0_44] : memref<256x36xf32, #tpu.memory_space<vmem>>, vector<256x36xf32>
    %c0_45 = arith.constant 0 : index
    %c0_46 = arith.constant 0 : index
    %37 = vector.load %arg2[%c0_45, %c0_46] : memref<36x16xf32, #tpu.memory_space<vmem>>, vector<36x16xf32>
    %cst = arith.constant dense<0.000000e+00> : vector<256x16xf32>
    %38 = tpu.matmul %36, %37, %cst {dimension_numbers = #tpu.dot_dimension_numbers<[1], [0], [0], [1], [0, 0, 1, 1], [], []>} : vector<256x36xf32>, vector<36x16xf32>, vector<256x16xf32> -> vector<256x16xf32>
    %c0_47 = arith.constant 0 : index
    %c0_48 = arith.constant 0 : index
    %39 = vector.load %arg3[%c0_47, %c0_48] : memref<1x16xf32, #tpu.memory_space<vmem>>, vector<1x16xf32>
    %40 = vector.broadcast %39 : vector<1x16xf32> to vector<256x16xf32>
    %41 = arith.addf %38, %40 : vector<256x16xf32>
    %42 = vector.shape_cast %41 : vector<256x16xf32> to vector<1x256x16xf32>
    %c0_49 = arith.constant 0 : index
    %c0_50 = arith.constant 0 : index
    %c0_51 = arith.constant 0 : index
    %43 = vector.load %arg4[%c0_49, %c0_50, %c0_51] : memref<1x256x16xf32, #tpu.memory_space<vmem>>, vector<1x256x16xf32>
    tpu.vector_store %arg4[%c0_49, %c0_50, %c0_51], %42 {strides = array<i32>} : memref<1x256x16xf32, #tpu.memory_space<vmem>>, vector<1x256x16xf32>,
    return
  }
  func.func @transform_0(%arg0: i32) -> (i32, i32, i32, i32) {
    %c0_i32 = arith.constant 0 : i32
    %c0_i32_0 = arith.constant 0 : i32
    %c0_i32_1 = arith.constant 0 : i32
    %c0_i32_2 = arith.constant 0 : i32
    return %arg0, %c0_i32, %c0_i32_0, %c0_i32_1 : i32, i32, i32, i32
  }
  func.func @transform_1(%arg0: i32) -> (i32, i32) {
    %c0_i32 = arith.constant 0 : i32
    %c0_i32_0 = arith.constant 0 : i32
    %c0_i32_1 = arith.constant 0 : i32
    return %c0_i32, %c0_i32_0 : i32, i32
  }
  func.func @transform_2(%arg0: i32) -> (i32, i32) {
    %c0_i32 = arith.constant 0 : i32
    %c0_i32_0 = arith.constant 0 : i32
    %c0_i32_1 = arith.constant 0 : i32
    return %c0_i32, %c0_i32_0 : i32, i32
  }
  func.func @transform_3(%arg0: i32) -> (i32, i32, i32) {
    %c0_i32 = arith.constant 0 : i32
    %c0_i32_0 = arith.constant 0 : i32
    %c0_i32_1 = arith.constant 0 : i32
    return %arg0, %c0_i32, %c0_i32_0 : i32, i32, i32
  }
}

</mosaic_0001>

<bundles_post_ra>
// kernel: tpu_custom_call.1
= control target key start
LH: loop header
LB: loop body
LE: loop exit
PB: predicated region body
PF: predicated region fallthrough
CT: control target
= control target key end

     0   :  { %s2635_s12 = smov 0   ;;  %s3794_s0 = inlined_call_operand.vmem [shape: f32[2,18,18,4], index: 0, kind: input, shape index: {}]   ;;  %s3795_s1 = inlined_call_operand.vmem [shape: f32[36,16], index: 1, kind: input, shape index: {}]   ;;  %s3796_s2 = inlined_call_operand.vmem [shape: f32[1,16], index: 2, kind: input, shape index: {}]   ;;  %s3797_s3 = inlined_call_operand.vmem [shape: f32[2,256,16], index: 3, kind: output, shape index: {}]  }
   0x1 LB: > { %s2240_s13 = sadd.s32 4294967295, %s2605_s12   ;;  %p2244_p0 = scmp.ge.s32.totalorder %s2605_s12, 1  ;;  %s2605_s12 = sphi %s2635_s12, %s13_s12  }
   0x2   : > { %p137_p1 = scmp.lt.s32.totalorder %s2605_s12, 3 }
   0x4   : > { %p138_p2 = pnand %p2244_p0, %p137_p1 }
   0x6   : > { %141 = sbr.rel (%p138_p2) target bundleno = 848 (0x350), region = 32 }
   0xb   : > { %p161_p3 = scmp.lt.s32.totalorder %s2240_s13, 1  ;;  %s2607_s18 = smov 4   ;;  %vm203_vm0 = vcmask 31744   ;;  %vm396_vm1 = vcmask 64544   ;;  %vm589_vm2 = vcmask 97344   ;;  %vm783_vm3 = vcmask 130144  }
   0xc   : > { %s2608_s19 = smov 8   ;;  %s2609_s20 = smov 12   ;;  %vm1923_vm4 = vcmask 1043456   ;;  %vm976_vm5 = vcmask 162944   ;;  %vm1169_vm6 = vcmask 195744   ;;  %vm1363_vm7 = vcmask 228544  }
   0xd   : > { %s3830_s13 = smov (!%p161_p3, %s2240_s13), 1  ;;  %s2610_s21 = smov 16   ;;  %vm1556_vm8 = vcmask 261344   ;;  %vm1749_vm9 = vcmask 294144   ;;  %vm1826_vm10 = vcmask 293888   ;;  %vm2152_vm11 = vcmask 130048  }
   0xe   : > { %s2582_s14 = smul.u32 432, %s3830_s13  ;;  %s2611_s22 = smov 20  }
   0xf   : > { %s2612_s23 = smov 24   ;;  %s2613_s24 = smov 28  }
  0x10   : > { %s2649_s17 = scalar_lea.vmem %s3794_s0, %s2582_s14  ;;  %s2614_s29 = smov 32  }
  0x11   : > { %v2652_v0 = vld [vmem:[%s2649_s17 + $0x19] sm:$0xff]  ;;  %v236_v1 = vld [vmem:[%s2649_s17 + $0x1] sm:$0xff]  ;;  %v237_v3 = vld [vmem:[%s2649_s17 + $0x9] sm:$0xff]  ;;  %s2476_s9 = sshll.u32 %s3830_s13, 8 }
  0x12   : > { %304 = vrot.lane.b32.xlu1 %v2652_v0, %s2607_s18  ;;  %300 = vrot.lane.b32.xlu0 %v236_v1, %s2607_s18  ;;  %v2659_v2 = vld [vmem:[%s2649_s17 + $0x21] sm:$0xff]  ;;  %v2666_v4 = vld [vmem:[%s2649_s17 + $0x39] sm:$0xff]  ;;  %s3659_s16 = scalar_lea.vmem %s3797_s3, %s2476_s9 }
  0x13   : > { %v2669_v5 = vld [vmem:[%s2649_s17 + $0x31] sm:$0xff]  ;;  %v2679_v7 = vld [vmem:[%s2649_s17 + $0x49] sm:$0xff]  ;;  %v2689_v9 = vld [vmem:[%s2649_s17 + $0x61] sm:$0xff] }
  0x14   : > { %v2676_v6 = vld [vmem:[%s2649_s17 + $0x51] sm:$0xff]  ;;  %v2686_v8 = vld [vmem:[%s2649_s17 + $0x69] sm:$0xff]  ;;  %v2696_v10 = vld [vmem:[%s2649_s17 + $0x81] sm:$0xff] }
  0x15   : > { %v2699_v11 = vld [vmem:[%s2649_s17 + $0x79] sm:$0xff]  ;;  %v2713_v15 = vld [vmem:[%s2649_s17 + $0x91] sm:$0xff]  ;;  %v172_v17 = vld [vmem:[%s2649_s17 + $0x8] sm:$0xff] }
  0x16   : > { %306 = vrot.lane.b32.xlu1 %v2659_v2, %s2607_s18  ;;  %302 = vrot.lane.b32.xlu0 %v237_v3, %s2607_s18  ;;  %v2706_v12 = vld [vmem:[%s2649_s17 + $0x18] sm:$0xff]  ;;  %v171_v13 = vld [vmem:[%s2649_s17] sm:$0xff]  ;;  %205 = vst.msk [vmem:[#allocation2 + $0x8] sm:$0xff] %vm203_vm0, %v172_v17 }
  0x17   : > { %v2710_v14 = vld [vmem:[%s2649_s17 + $0x99] sm:$0xff]  ;;  %206 = vst.msk [vmem:[#allocation2 + $0x10] sm:$0xff] %vm203_vm0, %v2706_v12  ;;  %204 = vst.msk [vmem:[#allocation2] sm:$0xff] %vm203_vm0, %v171_v13  ;;  %v251_v18 = vld [vmem:[%s2649_s17 + $0xb1] sm:$0xff] }
  0x18   : > { %v2719_v16 = vld [vmem:[%s2649_s17 + $0x20] sm:$0xff]  ;;  %v2727_v19 = vld [vmem:[%s2649_s17 + $0x38] sm:$0xff]  ;;  %v2730_v20 = vld [vmem:[%s2649_s17 + $0x30] sm:$0xff] }
  0x19   : > { %207 = vst.msk [vmem:[#allocation2 + $0x18] sm:$0xff] %vm203_vm0, %v2719_v16  ;;  %v250_v21 = vld [vmem:[%s2649_s17 + $0xa9] sm:$0xff]  ;;  %209 = vst.msk [vmem:[#allocation2 + $0x28] sm:$0xff] %vm203_vm0, %v2727_v19  ;;  %v2753_v25 = vld [vmem:[%s2649_s17 + $0x60] sm:$0xff] }
  0x1a   : > { %310 = vrot.lane.b32.xlu1 %v2666_v4, %s2607_s18  ;;  %308 = vrot.lane.b32.xlu0 %v2669_v5, %s2607_s18  ;;  %208 = vst.msk [vmem:[#allocation2 + $0x20] sm:$0xff] %vm203_vm0, %v2730_v20  ;;  %v2742_v22 = vld [vmem:[%s2649_s17 + $0x50] sm:$0xff]  ;;  %v2747_v23 = vld [vmem:[%s2649_s17 + $0x48] sm:$0xff]  ;;  %212 = vst.msk [vmem:[#allocation2 + $0x40] sm:$0xff] %vm203_vm0, %v2753_v25 }
  0x1b   : > { %211 = vst.msk [vmem:[#allocation2 + $0x38] sm:$0xff] %vm203_vm0, %v2742_v22  ;;  %v2750_v24 = vld [vmem:[%s2649_s17 + $0x68] sm:$0xff]  ;;  %210 = vst.msk [vmem:[#allocation2 + $0x30] sm:$0xff] %vm203_vm0, %v2747_v23  ;;  %v2762_v26 = vld [vmem:[%s2649_s17 + $0x80] sm:$0xff] }
  0x1c   : > { %213 = vst.msk [vmem:[#allocation2 + $0x48] sm:$0xff] %vm203_vm0, %v2750_v24  ;;  %v2765_v27 = vld [vmem:[%s2649_s17 + $0x78] sm:$0xff]  ;;  %v253_v29 = vld [vmem:[%s2649_s17 + $0xc9] sm:$0xff]  ;;  %v252_v30 = vld [vmem:[%s2649_s17 + $0xc1] sm:$0xff] }
  0x1d   : > { %v2768_v28 = vld [vmem:[%s2649_s17 + $0x98] sm:$0xff]  ;;  %215 = vst.msk [vmem:[#allocation2 + $0x58] sm:$0xff] %vm203_vm0, %v2762_v26  ;;  %214 = vst.msk [vmem:[#allocation2 + $0x50] sm:$0xff] %vm203_vm0, %v2765_v27  ;;  %v2779_v31 = vld [vmem:[%s2649_s17 + $0x90] sm:$0xff] }
  0x1e   : > { %314 = vrot.lane.b32.xlu1 %v2676_v6, %s2607_s18  ;;  %312 = vrot.lane.b32.xlu0 %v2679_v7, %s2607_s18  ;;  %217 = vst.msk [vmem:[#allocation2 + $0x68] sm:$0xff] %vm203_vm0, %v2768_v28  ;;  %v2782_v32 = vld [vmem:[%s2649_s17 + $0xb0] sm:$0xff]  ;;  %v2785_v33 = vld [vmem:[%s2649_s17 + $0xa8] sm:$0xff]  ;;  %216 = vst.msk [vmem:[#allocation2 + $0x60] sm:$0xff] %vm203_vm0, %v2779_v31 }
  0x1f   : > { %219 = vst.msk [vmem:[#allocation2 + $0x78] sm:$0xff] %vm203_vm0, %v2782_v32  ;;  %218 = vst.msk [vmem:[#allocation2 + $0x70] sm:$0xff] %vm203_vm0, %v2785_v33  ;;  %v2796_v34 = vld [vmem:[%s2649_s17 + $0xc8] sm:$0xff]  ;;  %v2799_v35 = vld [vmem:[%s2649_s17 + $0xc0] sm:$0xff] }
  0x20   : > { %221 = vst.msk [vmem:[#allocation2 + $0x88] sm:$0xff] %vm203_vm0, %v2796_v34  ;;  %220 = vst.msk [vmem:[#allocation2 + $0x80] sm:$0xff] %vm203_vm0, %v2799_v35  ;;  %v2806_v36 = vld [vmem:[%s2649_s17 + $0xe0] sm:$0xff]  ;;  %v2809_v37 = vld [vmem:[%s2649_s17 + $0xd8] sm:$0xff] }
  0x21   : > { %v2812_v38 = vld [vmem:[%s2649_s17 + $0xf8] sm:$0xff]  ;;  %223 = vst.msk [vmem:[#allocation2 + $0x98] sm:$0xff] %vm203_vm0, %v2806_v36  ;;  %222 = vst.msk [vmem:[#allocation2 + $0x90] sm:$0xff] %vm203_vm0, %v2809_v37  ;;  %v2821_v39 = vld [vmem:[%s2649_s17 + $0xf0] sm:$0xff] }
  0x22   : > { %318 = vrot.lane.b32.xlu1 %v2686_v8, %s2607_s18  ;;  %316 = vrot.lane.b32.xlu0 %v2689_v9, %s2607_s18  ;;  %225 = vst.msk [vmem:[#allocation2 + $0xa8] sm:$0xff] %vm203_vm0, %v2812_v38  ;;  %v2824_v40 = vld [vmem:[%s2649_s17 + $0x110] sm:$0xff]  ;;  %v2827_v41 = vld [vmem:[%s2649_s17 + $0x108] sm:$0xff]  ;;  %224 = vst.msk [vmem:[#allocation2 + $0xa0] sm:$0xff] %vm203_vm0, %v2821_v39 }
  0x23   : > { %227 = vst.msk [vmem:[#allocation2 + $0xb8] sm:$0xff] %vm203_vm0, %v2824_v40  ;;  %226 = vst.msk [vmem:[#allocation2 + $0xb0] sm:$0xff] %vm203_vm0, %v2827_v41  ;;  %v2838_v42 = vld [vmem:[%s2649_s17 + $0xe1] sm:$0xff]  ;;  %v2841_v43 = vld [vmem:[%s2649_s17 + $0xd9] sm:$0xff] }
  0x24   : > { %v2844_v44 = vld [vmem:[%s2649_s17 + $0x128] sm:$0xff]  ;;  %v2847_v45 = vld [vmem:[%s2649_s17 + $0x120] sm:$0xff]  ;;  %v2861_v47 = vld [vmem:[%s2649_s17 + $0xf1] sm:$0xff] }
  0x25   : > { %229 = vst.msk [vmem:[#allocation2 + $0xc8] sm:$0xff] %vm203_vm0, %v2844_v44  ;;  %228 = vst.msk [vmem:[#allocation2 + $0xc0] sm:$0xff] %vm203_vm0, %v2847_v45  ;;  %v2858_v46 = vld [vmem:[%s2649_s17 + $0xf9] sm:$0xff]  ;;  %v2878_v50 = vld [vmem:[%s2649_s17 + $0x111] sm:$0xff] }
  0x26   : > { %322 = vrot.lane.b32.xlu1 %v2696_v10, %s2607_s18  ;;  %320 = vrot.lane.b32.xlu0 %v2699_v11, %s2607_s18  ;;  %v2864_v48 = vld [vmem:[%s2649_s17 + $0x140] sm:$0xff]  ;;  %v2867_v49 = vld [vmem:[%s2649_s17 + $0x138] sm:$0xff]  ;;  %3813 = vst [vmem:[#allocation3_spill] sm:$0xff] %v2878_v50 }
  0x27   : > { %231 = vst.msk [vmem:[#allocation2 + $0xd8] sm:$0xff] %vm203_vm0, %v2864_v48  ;;  %230 = vst.msk [vmem:[#allocation2 + $0xd0] sm:$0xff] %vm203_vm0, %v2867_v49  ;;  %v2881_v51 = vld [vmem:[%s2649_s17 + $0x109] sm:$0xff]  ;;  %v2884_v52 = vld [vmem:[%s2649_s17 + $0x158] sm:$0xff] }
  0x28   : > { %3814 = vst [vmem:[#allocation4_spill] sm:$0xff] %v2881_v51  ;;  %v2887_v53 = vld [vmem:[%s2649_s17 + $0x150] sm:$0xff]  ;;  %233 = vst.msk [vmem:[#allocation2 + $0xe8] sm:$0xff] %vm203_vm0, %v2884_v52  ;;  %v260_v55 = vld [vmem:[%s2649_s17 + $0x121] sm:$0xff] }
  0x29   : > { %232 = vst.msk [vmem:[#allocation2 + $0xe0] sm:$0xff] %vm203_vm0, %v2887_v53  ;;  %v261_v54 = vld [vmem:[%s2649_s17 + $0x129] sm:$0xff]  ;;  %v263_v58 = vld [vmem:[%s2649_s17 + $0x141] sm:$0xff]  ;;  %v262_v59 = vld [vmem:[%s2649_s17 + $0x139] sm:$0xff] }
  0x2a   : > { %326 = vrot.lane.b32.xlu1 %v2710_v14, %s2607_s18  ;;  %324 = vrot.lane.b32.xlu0 %v2713_v15, %s2607_s18  ;;  %v2900_v56 = vld [vmem:[%s2649_s17 + $0x170] sm:$0xff]  ;;  %v2903_v57 = vld [vmem:[%s2649_s17 + $0x168] sm:$0xff] }
  0x2b   : > { %235 = vst.msk [vmem:[#allocation2 + $0xf8] sm:$0xff] %vm203_vm0, %v2900_v56  ;;  %234 = vst.msk [vmem:[#allocation2 + $0xf0] sm:$0xff] %vm203_vm0, %v2903_v57  ;;  %v265_v60 = vld [vmem:[%s2649_s17 + $0x159] sm:$0xff]  ;;  %v264_v61 = vld [vmem:[%s2649_s17 + $0x151] sm:$0xff] }
  0x2c   : > { %v267_v62 = vld [vmem:[%s2649_s17 + $0x171] sm:$0xff]  ;;  %v266_v63 = vld [vmem:[%s2649_s17 + $0x169] sm:$0xff]  ;;  %v2931_v17 = vld [vmem:[%s2649_s17 + $0x1a] sm:$0xff] }
  0x2d   : > { %v430_v1 = vld [vmem:[%s2649_s17 + $0xa] sm:$0xff]  ;;  %v429_v3 = vld [vmem:[%s2649_s17 + $0x2] sm:$0xff] }
  0x2e   : > { %330 = vrot.lane.b32.xlu1 %v251_v18, %s2607_s18  ;;  %328 = vrot.lane.b32.xlu0 %v250_v21, %s2607_s18  ;;  %v2928_v13 = vld [vmem:[%s2649_s17 + $0x22] sm:$0xff]  ;;  %v2938_v18 = vld [vmem:[%s2649_s17 + $0x3a] sm:$0xff] }
  0x2f   : > { %v2941_v21 = vld [vmem:[%s2649_s17 + $0x32] sm:$0xff] }
  0x32   : > { %334 = vrot.lane.b32.xlu1 %v253_v29, %s2607_s18  ;;  %332 = vrot.lane.b32.xlu0 %v252_v30, %s2607_s18  ;;  %v2948_v29 = vld [vmem:[%s2649_s17 + $0x52] sm:$0xff]  ;;  %v2951_v30 = vld [vmem:[%s2649_s17 + $0x4a] sm:$0xff] }
  0x33   : > { %3815 = vst [vmem:[#allocation5_spill] sm:$0xff] %v2948_v29  ;;  %3816 = vst [vmem:[#allocation6_spill] sm:$0xff] %v2951_v30 }
  0x36   : > { %338 = vrot.lane.b32.xlu1 %v2838_v42, %s2607_s18  ;;  %336 = vrot.lane.b32.xlu0 %v2841_v43, %s2607_s18 }
  0x3a   : > { %342 = vrot.lane.b32.xlu1 %v2858_v46, %s2607_s18  ;;  %340 = vrot.lane.b32.xlu0 %v2861_v47, %s2607_s18 }
  0x3e   : > { %346 = vrot.lane.b32.xlu1 %v2878_v50, %s2607_s18  ;;  %344 = vrot.lane.b32.xlu0 %v2881_v51, %s2607_s18 }
  0x42   : > { %350 = vrot.lane.b32.xlu1 %v261_v54, %s2607_s18  ;;  %348 = vrot.lane.b32.xlu0 %v260_v55, %s2607_s18  ;;  %v438_v54 = vld [vmem:[%s2649_s17 + $0x6a] sm:$0xff]  ;;  %v437_v55 = vld [vmem:[%s2649_s17 + $0x62] sm:$0xff] }
  0x46   : > { %354 = vrot.lane.b32.xlu1 %v263_v58, %s2607_s18  ;;  %352 = vrot.lane.b32.xlu0 %v262_v59, %s2607_s18  ;;  %v440_v58 = vld [vmem:[%s2649_s17 + $0x82] sm:$0xff]  ;;  %v439_v59 = vld [vmem:[%s2649_s17 + $0x7a] sm:$0xff] }
  0x4a   : > { %358 = vrot.lane.b32.xlu1 %v265_v60, %s2607_s18  ;;  %356 = vrot.lane.b32.xlu0 %v264_v61, %s2607_s18  ;;  %v442_v60 = vld [vmem:[%s2649_s17 + $0x9a] sm:$0xff]  ;;  %v441_v61 = vld [vmem:[%s2649_s17 + $0x92] sm:$0xff] }
  0x4e   : > { %362 = vrot.lane.b32.xlu1 %v267_v62, %s2607_s18  ;;  %360 = vrot.lane.b32.xlu0 %v266_v63, %s2607_s18  ;;  %v444_v62 = vld [vmem:[%s2649_s17 + $0xb2] sm:$0xff]  ;;  %v443_v63 = vld [vmem:[%s2649_s17 + $0xaa] sm:$0xff] }
  0x52   : > { %495 = vrot.lane.b32.xlu1 %v430_v1, %s2608_s19  ;;  %493 = vrot.lane.b32.xlu0 %v429_v3, %s2608_s19  ;;  %v446_v1 = vld [vmem:[%s2649_s17 + $0xca] sm:$0xff]  ;;  %v445_v3 = vld [vmem:[%s2649_s17 + $0xc2] sm:$0xff] }
  0x56   : > { %499 = vrot.lane.b32.xlu1 %v2928_v13, %s2608_s19  ;;  %497 = vrot.lane.b32.xlu0 %v2931_v17, %s2608_s19 }
  0x5a   : > { %503 = vrot.lane.b32.xlu1 %v2938_v18, %s2608_s19  ;;  %501 = vrot.lane.b32.xlu0 %v2941_v21, %s2608_s19 }
  0x5e   : > { %507 = vrot.lane.b32.xlu1 %v2948_v29, %s2608_s19  ;;  %505 = vrot.lane.b32.xlu0 %v2951_v30, %s2608_s19 }
  0x62   : > { %511 = vrot.lane.b32.xlu1 %v438_v54, %s2608_s19  ;;  %509 = vrot.lane.b32.xlu0 %v437_v55, %s2608_s19  ;;  %v2978_v54 = vld [vmem:[%s2649_s17 + $0xe2] sm:$0xff]  ;;  %v2981_v55 = vld [vmem:[%s2649_s17 + $0xda] sm:$0xff] }
  0x66   : > { %515 = vrot.lane.b32.xlu1 %v440_v58, %s2608_s19  ;;  %513 = vrot.lane.b32.xlu0 %v439_v59, %s2608_s19  ;;  %v2988_v58 = vld [vmem:[%s2649_s17 + $0xfa] sm:$0xff]  ;;  %v2991_v59 = vld [vmem:[%s2649_s17 + $0xf2] sm:$0xff] }
  0x6a   : > { %519 = vrot.lane.b32.xlu1 %v442_v60, %s2608_s19  ;;  %517 = vrot.lane.b32.xlu0 %v441_v61, %s2608_s19  ;;  %v2998_v60 = vld [vmem:[%s2649_s17 + $0x112] sm:$0xff]  ;;  %v3001_v61 = vld [vmem:[%s2649_s17 + $0x10a] sm:$0xff] }
  0x6b   : > { %3817 = vst [vmem:[#allocation7_spill] sm:$0xff] %v2998_v60  ;;  %3818 = vst [vmem:[#allocation8_spill] sm:$0xff] %v3001_v61 }
  0x6e   : > { %523 = vrot.lane.b32.xlu1 %v444_v62, %s2608_s19  ;;  %521 = vrot.lane.b32.xlu0 %v443_v63, %s2608_s19  ;;  %v3008_v62 = vld [vmem:[%s2649_s17 + $0x12a] sm:$0xff]  ;;  %v3011_v63 = vld [vmem:[%s2649_s17 + $0x122] sm:$0xff] }
  0x6f   : > { %3819 = vst [vmem:[#allocation9_spill] sm:$0xff] %v3008_v62  ;;  %3820 = vst [vmem:[#allocation10_spill] sm:$0xff] %v3011_v63 }
  0x72   : > { %527 = vrot.lane.b32.xlu1 %v446_v1, %s2608_s19  ;;  %525 = vrot.lane.b32.xlu0 %v445_v3, %s2608_s19  ;;  %v456_v1 = vld [vmem:[%s2649_s17 + $0x142] sm:$0xff]  ;;  %v455_v3 = vld [vmem:[%s2649_s17 + $0x13a] sm:$0xff] }
  0x76   : > { %531 = vrot.lane.b32.xlu1 %v2978_v54, %s2608_s19  ;;  %529 = vrot.lane.b32.xlu0 %v2981_v55, %s2608_s19 }
  0x7a   : > { %535 = vrot.lane.b32.xlu1 %v2988_v58, %s2608_s19  ;;  %533 = vrot.lane.b32.xlu0 %v2991_v59, %s2608_s19 }
  0x7e   : > { %539 = vrot.lane.b32.xlu1 %v2998_v60, %s2608_s19  ;;  %537 = vrot.lane.b32.xlu0 %v3001_v61, %s2608_s19  ;;  %v458_v61 = vld [vmem:[%s2649_s17 + $0x15a] sm:$0xff] }
  0x82   : > { %543 = vrot.lane.b32.xlu1 %v3008_v62, %s2608_s19  ;;  %541 = vrot.lane.b32.xlu0 %v3011_v63, %s2608_s19  ;;  %v457_v62 = vld [vmem:[%s2649_s17 + $0x152] sm:$0xff] }
  0x83   : > { %v460_v63 = vld [vmem:[%s2649_s17 + $0x172] sm:$0xff] }
  0x84   : > { %v305_v29 = vpop.permute.xlu1 %304  ;;  %v301_v60 = vpop.permute.xlu0 %300 }
  0x85   : > { %399 = vst.msk [vmem:[#allocation2 + $0x10] sm:$0xff] %vm396_vm1, %v305_v29  ;;  %397 = vst.msk [vmem:[#allocation2] sm:$0xff] %vm396_vm1, %v301_v60  ;;  %v459_v29 = vld [vmem:[%s2649_s17 + $0x16a] sm:$0xff] }
  0x86   : > { %547 = vrot.lane.b32.xlu1 %v456_v1, %s2608_s19  ;;  %545 = vrot.lane.b32.xlu0 %v455_v3, %s2608_s19 }
  0x88   : > { %v307_v50 = vpop.permute.xlu1 %306  ;;  %v303_v30 = vpop.permute.xlu0 %302 }
  0x89   : > { %400 = vst.msk [vmem:[#allocation2 + $0x18] sm:$0xff] %vm396_vm1, %v307_v50  ;;  %398 = vst.msk [vmem:[#allocation2 + $0x8] sm:$0xff] %vm396_vm1, %v303_v30 }
  0x8a   : > { %551 = vrot.lane.b32.xlu1 %v458_v61, %s2608_s19  ;;  %549 = vrot.lane.b32.xlu0 %v457_v62, %s2608_s19 }
  0x8c   : > { %v311_v51 = vpop.permute.xlu1 %310  ;;  %v309_v60 = vpop.permute.xlu0 %308 }
  0x8d   : > { %402 = vst.msk [vmem:[#allocation2 + $0x28] sm:$0xff] %vm396_vm1, %v311_v51  ;;  %401 = vst.msk [vmem:[#allocation2 + $0x20] sm:$0xff] %vm396_vm1, %v309_v60 }
  0x8e   : > { %555 = vrot.lane.b32.xlu1 %v460_v63, %s2608_s19  ;;  %553 = vrot.lane.b32.xlu0 %v459_v29, %s2608_s19 }
  0x90   : > { %v315_v1 = vpop.permute.xlu1 %314  ;;  %v313_v50 = vpop.permute.xlu0 %312 }
  0x91   : > { %404 = vst.msk [vmem:[#allocation2 + $0x38] sm:$0xff] %vm396_vm1, %v315_v1  ;;  %403 = vst.msk [vmem:[#allocation2 + $0x30] sm:$0xff] %vm396_vm1, %v313_v50 }
  0x92   : > { %689 = vrot.lane.b32.xlu1 %v2719_v16, %s2609_s20  ;;  %687 = vrot.lane.b32.xlu0 %v2706_v12, %s2609_s20 }
  0x94   : > { %v319_v51 = vpop.permute.xlu1 %318  ;;  %v317_v30 = vpop.permute.xlu0 %316 }
  0x95   : > { %406 = vst.msk [vmem:[#allocation2 + $0x48] sm:$0xff] %vm396_vm1, %v319_v51  ;;  %405 = vst.msk [vmem:[#allocation2 + $0x40] sm:$0xff] %vm396_vm1, %v317_v30 }
  0x96   : > { %693 = vrot.lane.b32.xlu1 %v2727_v19, %s2609_s20  ;;  %691 = vrot.lane.b32.xlu0 %v2730_v20, %s2609_s20 }
  0x98   : > { %v323_v61 = vpop.permute.xlu1 %322  ;;  %v321_v62 = vpop.permute.xlu0 %320 }
  0x99   : > { %408 = vst.msk [vmem:[#allocation2 + $0x58] sm:$0xff] %vm396_vm1, %v323_v61  ;;  %407 = vst.msk [vmem:[#allocation2 + $0x50] sm:$0xff] %vm396_vm1, %v321_v62 }
  0x9a   : > { %697 = vrot.lane.b32.xlu1 %v2742_v22, %s2609_s20  ;;  %695 = vrot.lane.b32.xlu0 %v2747_v23, %s2609_s20 }
  0x9c   : > { %v327_v12 = vpop.permute.xlu1 %326  ;;  %v325_v16 = vpop.permute.xlu0 %324 }
  0x9d   : > { %410 = vst.msk [vmem:[#allocation2 + $0x68] sm:$0xff] %vm396_vm1, %v327_v12  ;;  %409 = vst.msk [vmem:[#allocation2 + $0x60] sm:$0xff] %vm396_vm1, %v325_v16 }
  0x9e   : > { %701 = vrot.lane.b32.xlu1 %v2750_v24, %s2609_s20  ;;  %699 = vrot.lane.b32.xlu0 %v2753_v25, %s2609_s20 }
  0xa0   : > { %v331_v63 = vpop.permute.xlu1 %330  ;;  %v329_v3 = vpop.permute.xlu0 %328 }
  0xa1   : > { %412 = vst.msk [vmem:[#allocation2 + $0x78] sm:$0xff] %vm396_vm1, %v331_v63  ;;  %411 = vst.msk [vmem:[#allocation2 + $0x70] sm:$0xff] %vm396_vm1, %v329_v3 }
  0xa2   : > { %705 = vrot.lane.b32.xlu1 %v2762_v26, %s2609_s20  ;;  %703 = vrot.lane.b32.xlu0 %v2765_v27, %s2609_s20 }
  0xa4   : > { %v335_v29 = vpop.permute.xlu1 %334  ;;  %v333_v60 = vpop.permute.xlu0 %332 }
  0xa5   : > { %414 = vst.msk [vmem:[#allocation2 + $0x88] sm:$0xff] %vm396_vm1, %v335_v29  ;;  %413 = vst.msk [vmem:[#allocation2 + $0x80] sm:$0xff] %vm396_vm1, %v333_v60  ;;  %v2279_v29 = vld [vmem:[%s2649_s17 + $0x188] sm:$0xff]  ;;  %v2278_v60 = vld [vmem:[%s2649_s17 + $0x180] sm:$0xff] }
  0xa6   : > { %709 = vrot.lane.b32.xlu1 %v2768_v28, %s2609_s20  ;;  %707 = vrot.lane.b32.xlu0 %v2779_v31, %s2609_s20 }
  0xa8   : > { %v339_v1 = vpop.permute.xlu1 %338  ;;  %v337_v50 = vpop.permute.xlu0 %336 }
  0xa9   : > { %416 = vst.msk [vmem:[#allocation2 + $0x98] sm:$0xff] %vm396_vm1, %v339_v1  ;;  %415 = vst.msk [vmem:[#allocation2 + $0x90] sm:$0xff] %vm396_vm1, %v337_v50 }
  0xaa   : > { %713 = vrot.lane.b32.xlu1 %v2782_v32, %s2609_s20  ;;  %711 = vrot.lane.b32.xlu0 %v2785_v33, %s2609_s20 }
  0xac   : > { %v343_v51 = vpop.permute.xlu1 %342  ;;  %v341_v30 = vpop.permute.xlu0 %340 }
  0xad   : > { %418 = vst.msk [vmem:[#allocation2 + $0xa8] sm:$0xff] %vm396_vm1, %v343_v51  ;;  %417 = vst.msk [vmem:[#allocation2 + $0xa0] sm:$0xff] %vm396_vm1, %v341_v30 }
  0xae   : > { %717 = vrot.lane.b32.xlu1 %v2796_v34, %s2609_s20  ;;  %715 = vrot.lane.b32.xlu0 %v2799_v35, %s2609_s20 }
  0xb0   : > { %v347_v28 = vpop.permute.xlu1 %346  ;;  %v345_v31 = vpop.permute.xlu0 %344 }
  0xb1   : > { %420 = vst.msk [vmem:[#allocation2 + $0xb8] sm:$0xff] %vm396_vm1, %v347_v28  ;;  %419 = vst.msk [vmem:[#allocation2 + $0xb0] sm:$0xff] %vm396_vm1, %v345_v31 }
  0xb2   : > { %721 = vrot.lane.b32.xlu1 %v2806_v36, %s2609_s20  ;;  %719 = vrot.lane.b32.xlu0 %v2809_v37, %s2609_s20 }
  0xb4   : > { %v351_v32 = vpop.permute.xlu1 %350  ;;  %v349_v33 = vpop.permute.xlu0 %348 }
  0xb5   : > { %422 = vst.msk [vmem:[#allocation2 + $0xc8] sm:$0xff] %vm396_vm1, %v351_v32  ;;  %421 = vst.msk [vmem:[#allocation2 + $0xc0] sm:$0xff] %vm396_vm1, %v349_v33 }
  0xb6   : > { %725 = vrot.lane.b32.xlu1 %v2812_v38, %s2609_s20  ;;  %723 = vrot.lane.b32.xlu0 %v2821_v39, %s2609_s20 }
  0xb8   : > { %v355_v34 = vpop.permute.xlu1 %354  ;;  %v353_v35 = vpop.permute.xlu0 %352 }
  0xb9   : > { %424 = vst.msk [vmem:[#allocation2 + $0xd8] sm:$0xff] %vm396_vm1, %v355_v34  ;;  %423 = vst.msk [vmem:[#allocation2 + $0xd0] sm:$0xff] %vm396_vm1, %v353_v35 }
  0xba   : > { %729 = vrot.lane.b32.xlu1 %v2824_v40, %s2609_s20  ;;  %727 = vrot.lane.b32.xlu0 %v2827_v41, %s2609_s20 }
  0xbc   : > { %v359_v36 = vpop.permute.xlu1 %358  ;;  %v357_v37 = vpop.permute.xlu0 %356 }
  0xbd   : > { %426 = vst.msk [vmem:[#allocation2 + $0xe8] sm:$0xff] %vm396_vm1, %v359_v36  ;;  %425 = vst.msk [vmem:[#allocation2 + $0xe0] sm:$0xff] %vm396_vm1, %v357_v37  ;;  %v1817_v36 = vld [vmem:[%s3795_s1 + $0x18] sm:$0xff] }
  0xbe   : > { %733 = vrot.lane.b32.xlu1 %v2844_v44, %s2609_s20  ;;  %731 = vrot.lane.b32.xlu0 %v2847_v45, %s2609_s20 }
  0xc0   : > { %v363_v61 = vpop.permute.xlu1 %362  ;;  %v361_v62 = vpop.permute.xlu0 %360 }
  0xc1   : > { %428 = vst.msk [vmem:[#allocation2 + $0xf8] sm:$0xff] %vm396_vm1, %v363_v61  ;;  %427 = vst.msk [vmem:[#allocation2 + $0xf0] sm:$0xff] %vm396_vm1, %v361_v62  ;;  %v1815_v61 = vld [vmem:[%s3795_s1 + $0x8] sm:$0xff]  ;;  %v1814_v62 = vld [vmem:[%s3795_s1] sm:$0xff] }
  0xc2   : > { %737 = vrot.lane.b32.xlu1 %v2864_v48, %s2609_s20  ;;  %735 = vrot.lane.b32.xlu0 %v2867_v49, %s2609_s20 }
  0xc4   : > { %v496_v12 = vpop.permute.xlu1 %495  ;;  %v494_v16 = vpop.permute.xlu0 %493 }
  0xc5   : > { %591 = vst.msk [vmem:[#allocation2 + $0x8] sm:$0xff] %vm589_vm2, %v496_v12  ;;  %590 = vst.msk [vmem:[#allocation2] sm:$0xff] %vm589_vm2, %v494_v16 }
  0xc6   : > { %741 = vrot.lane.b32.xlu1 %v2884_v52, %s2609_s20  ;;  %739 = vrot.lane.b32.xlu0 %v2887_v53, %s2609_s20 }
  0xc8   : > { %v500_v63 = vpop.permute.xlu1 %499  ;;  %v498_v3 = vpop.permute.xlu0 %497 }
  0xc9   : > { %593 = vst.msk [vmem:[#allocation2 + $0x18] sm:$0xff] %vm589_vm2, %v500_v63  ;;  %592 = vst.msk [vmem:[#allocation2 + $0x10] sm:$0xff] %vm589_vm2, %v498_v3 }
  0xca   : > { %745 = vrot.lane.b32.xlu1 %v2900_v56, %s2609_s20  ;;  %743 = vrot.lane.b32.xlu0 %v2903_v57, %s2609_s20 }
  0xcc   : > { %v504_v1 = vpop.permute.xlu1 %503  ;;  %v502_v50 = vpop.permute.xlu0 %501 }
  0xcd   : > { %595 = vst.msk [vmem:[#allocation2 + $0x28] sm:$0xff] %vm589_vm2, %v504_v1  ;;  %594 = vst.msk [vmem:[#allocation2 + $0x20] sm:$0xff] %vm589_vm2, %v502_v50 }
  0xce   : > { %749 = vrot.lane.b32.xlu1 %v2279_v29, %s2609_s20  ;;  %747 = vrot.lane.b32.xlu0 %v2278_v60, %s2609_s20 }
  0xd0   : > { %v508_v51 = vpop.permute.xlu1 %507  ;;  %v506_v30 = vpop.permute.xlu0 %505 }
  0xd1   : > { %597 = vst.msk [vmem:[#allocation2 + $0x38] sm:$0xff] %vm589_vm2, %v508_v51  ;;  %596 = vst.msk [vmem:[#allocation2 + $0x30] sm:$0xff] %vm589_vm2, %v506_v30  ;;  %v3823_v51 = vld [vmem:[#allocation3_spill] sm:$0xff] }
  0xd2   : > { %882 = vrot.lane.b32.xlu1 %v2659_v2, %s2610_s21  ;;  %880 = vrot.lane.b32.xlu0 %v2652_v0, %s2610_s21 }
  0xd4   : > { %v512_v56 = vpop.permute.xlu1 %511  ;;  %v510_v57 = vpop.permute.xlu0 %509 }
  0xd5   : > { %599 = vst.msk [vmem:[#allocation2 + $0x48] sm:$0xff] %vm589_vm2, %v512_v56  ;;  %598 = vst.msk [vmem:[#allocation2 + $0x40] sm:$0xff] %vm589_vm2, %v510_v57 }
  0xd6   : > { %886 = vrot.lane.b32.xlu1 %v2666_v4, %s2610_s21  ;;  %884 = vrot.lane.b32.xlu0 %v2669_v5, %s2610_s21 }
  0xd8   : > { %v516_v28 = vpop.permute.xlu1 %515  ;;  %v514_v31 = vpop.permute.xlu0 %513 }
  0xd9   : > { %601 = vst.msk [vmem:[#allocation2 + $0x58] sm:$0xff] %vm589_vm2, %v516_v28  ;;  %600 = vst.msk [vmem:[#allocation2 + $0x50] sm:$0xff] %vm589_vm2, %v514_v31 }
  0xda   : > { %890 = vrot.lane.b32.xlu1 %v2676_v6, %s2610_s21  ;;  %888 = vrot.lane.b32.xlu0 %v2679_v7, %s2610_s21 }
  0xdc   : > { %v520_v0 = vpop.permute.xlu1 %519  ;;  %v518_v2 = vpop.permute.xlu0 %517 }
  0xdd   : > { %603 = vst.msk [vmem:[#allocation2 + $0x68] sm:$0xff] %vm589_vm2, %v520_v0  ;;  %602 = vst.msk [vmem:[#allocation2 + $0x60] sm:$0xff] %vm589_vm2, %v518_v2  ;;  %v3825_v2 = vld [vmem:[#allocation7_spill] sm:$0xff] }
  0xde   : > { %894 = vrot.lane.b32.xlu1 %v2686_v8, %s2610_s21  ;;  %892 = vrot.lane.b32.xlu0 %v2689_v9, %s2610_s21 }
  0xe0   : > { %v524_v32 = vpop.permute.xlu1 %523  ;;  %v522_v33 = vpop.permute.xlu0 %521 }
  0xe1   : > { %605 = vst.msk [vmem:[#allocation2 + $0x78] sm:$0xff] %vm589_vm2, %v524_v32  ;;  %604 = vst.msk [vmem:[#allocation2 + $0x70] sm:$0xff] %vm589_vm2, %v522_v33  ;;  %v3826_v32 = vld [vmem:[#allocation5_spill] sm:$0xff] }
  0xe2   : > { %898 = vrot.lane.b32.xlu1 %v2696_v10, %s2610_s21  ;;  %896 = vrot.lane.b32.xlu0 %v2699_v11, %s2610_s21 }
  0xe4   : > { %v528_v34 = vpop.permute.xlu1 %527  ;;  %v526_v35 = vpop.permute.xlu0 %525 }
  0xe5   : > { %607 = vst.msk [vmem:[#allocation2 + $0x88] sm:$0xff] %vm589_vm2, %v528_v34  ;;  %606 = vst.msk [vmem:[#allocation2 + $0x80] sm:$0xff] %vm589_vm2, %v526_v35 }
  0xe6   : > { %902 = vrot.lane.b32.xlu1 %v2710_v14, %s2610_s21  ;;  %900 = vrot.lane.b32.xlu0 %v2713_v15, %s2610_s21 }
  0xe8   : > { %v532_v8 = vpop.permute.xlu1 %531  ;;  %v530_v9 = vpop.permute.xlu0 %529 }
  0xe9   : > { %609 = vst.msk [vmem:[#allocation2 + $0x98] sm:$0xff] %vm589_vm2, %v532_v8  ;;  %608 = vst.msk [vmem:[#allocation2 + $0x90] sm:$0xff] %vm589_vm2, %v530_v9 }
  0xea   : > { %914 = vrot.lane.b32.xlu1 %v2838_v42, %s2610_s21  ;;  %912 = vrot.lane.b32.xlu0 %v2841_v43, %s2610_s21 }
  0xec   : > { %v536_v10 = vpop.permute.xlu1 %535  ;;  %v534_v11 = vpop.permute.xlu0 %533 }
  0xed   : > { %611 = vst.msk [vmem:[#allocation2 + $0xa8] sm:$0xff] %vm589_vm2, %v536_v10  ;;  %610 = vst.msk [vmem:[#allocation2 + $0xa0] sm:$0xff] %vm589_vm2, %v534_v11  ;;  %v2396_v11 = vld [vmem:[%s2649_s17 + $0x121] sm:$0xff] }
  0xee   : > { %1105 = vrot.lane.b32.xlu1 %v2981_v55, %s2611_s22  ;;  %1073 = vrot.lane.b32.xlu0 %v2931_v17, %s2611_s22 }
  0xf0   : > { %v540_v14 = vpop.permute.xlu1 %539  ;;  %v538_v15 = vpop.permute.xlu0 %537 }
  0xf1   : > { %613 = vst.msk [vmem:[#allocation2 + $0xb8] sm:$0xff] %vm589_vm2, %v540_v14  ;;  %612 = vst.msk [vmem:[#allocation2 + $0xb0] sm:$0xff] %vm589_vm2, %v538_v15  ;;  %v2381_v15 = vld [vmem:[%s2649_s17 + $0x69] sm:$0xff] }
  0xf2   : > { %1107 = vrot.lane.b32.xlu1 %v2978_v54, %s2611_s22  ;;  %1075 = vrot.lane.b32.xlu0 %v2928_v13, %s2611_s22 }
  0xf4   : > { %v544_v42 = vpop.permute.xlu1 %543  ;;  %v542_v43 = vpop.permute.xlu0 %541 }
  0xf5   : > { %615 = vst.msk [vmem:[#allocation2 + $0xc8] sm:$0xff] %vm589_vm2, %v544_v42  ;;  %614 = vst.msk [vmem:[#allocation2 + $0xc0] sm:$0xff] %vm589_vm2, %v542_v43  ;;  %v2397_v43 = vld [vmem:[%s2649_s17 + $0x129] sm:$0xff] }
  0xf6   : > { %1299 = vrot.lane.b32.xlu1 %v2821_v39, %s2612_s23  ;;  %1267 = vrot.lane.b32.xlu0 %v2730_v20, %s2612_s23 }
  0xf8   : > { %v548_v17 = vpop.permute.xlu1 %547  ;;  %v546_v55 = vpop.permute.xlu0 %545 }
  0xf9   : > { %617 = vst.msk [vmem:[#allocation2 + $0xd8] sm:$0xff] %vm589_vm2, %v548_v17  ;;  %616 = vst.msk [vmem:[#allocation2 + $0xd0] sm:$0xff] %vm589_vm2, %v546_v55 }
  0xfa   : > { %1301 = vrot.lane.b32.xlu1 %v2812_v38, %s2612_s23  ;;  %1269 = vrot.lane.b32.xlu0 %v2727_v19, %s2612_s23  ;;  %v1818_v19 = vld [vmem:[%s3795_s1 + $0x20] sm:$0xf] }
  0xfb   : > { %2514 = vmatprep.subr.msk.mxu0 %vm1923_vm4, %v1818_v19  ;;  %2572 = vmatprep.subr.msk.mxu1 %vm1923_vm4, %v1818_v19 }
  0xfc   : > { %v552_v13 = vpop.permute.xlu1 %551  ;;  %v550_v54 = vpop.permute.xlu0 %549  ;;  %2515 = vmatpush3.msk.msra.mxu0 %vm1923_vm4, %v1818_v19  ;;  %2577 = vmatpush3.msk.msra.mxu1 %vm1923_vm4, %v1818_v19 }
  0xfd   : > { %619 = vst.msk [vmem:[#allocation2 + $0xe8] sm:$0xff] %vm589_vm2, %v552_v13  ;;  %618 = vst.msk [vmem:[#allocation2 + $0xe0] sm:$0xff] %vm589_vm2, %v550_v54  ;;  %2516 = vmatprep.subr.mxu0 %v1817_v36  ;;  %2573 = vmatprep.subr.mxu1 %v1817_v36 }
  0xfe   : > { %1492 = vrot.lane.b32.xlu1 %v2861_v47, %s2613_s24  ;;  %1460 = vrot.lane.b32.xlu0 %v2669_v5, %s2613_s24 }
  0xff   : > { %2517 = vmatpush3.msra.mxu0 %v1817_v36  ;;  %2578 = vmatpush3.msra.mxu1 %v1817_v36 }
 0x100   : > { %v556_v20 = vpop.permute.xlu1 %555  ;;  %v554_v39 = vpop.permute.xlu0 %553 }
 0x101   : > { %621 = vst.msk [vmem:[#allocation2 + $0xf8] sm:$0xff] %vm589_vm2, %v556_v20  ;;  %620 = vst.msk [vmem:[#allocation2 + $0xf0] sm:$0xff] %vm589_vm2, %v554_v39  ;;  %v3827_v20 = vld [vmem:[#allocation10_spill] sm:$0xff] }
 0x102   : > { %1462 = vrot.lane.b32.xlu1 %v2666_v4, %s2613_s24  ;;  %916 = vrot.lane.b32.xlu0 %v2861_v47, %s2610_s21  ;;  %v1816_v4 = vld [vmem:[%s3795_s1 + $0x10] sm:$0xff] }
 0x103   : > { %2518 = vmatprep.subr.mxu0 %v1816_v4  ;;  %2574 = vmatprep.subr.mxu1 %v1816_v4 }
 0x104   : > { %v690_v5 = vpop.permute.xlu1 %689  ;;  %v688_v38 = vpop.permute.xlu0 %687  ;;  %2519 = vmatpush3.msra.mxu0 %v1816_v4  ;;  %2579 = vmatpush3.msra.mxu1 %v1816_v4  ;;  %v3828_v4 = vld [vmem:[#allocation9_spill] sm:$0xff] }
 0x105   : > { %785 = vst.msk [vmem:[#allocation2 + $0x8] sm:$0xff] %vm783_vm3, %v690_v5  ;;  %784 = vst.msk [vmem:[#allocation2] sm:$0xff] %vm783_vm3, %v688_v38  ;;  %2520 = vmatprep.subr.mxu0 %v1815_v61  ;;  %2575 = vmatprep.subr.mxu1 %v1815_v61  ;;  %v2413_v5 = vld [vmem:[%s2649_s17 + $0x6a] sm:$0xff] }
 0x106   : > { %1653 = vrot.lane.b32.xlu1 %v2941_v21, %s2614_s29  ;;  %1494 = vrot.lane.b32.xlu0 %v2858_v46, %s2613_s24 }
 0x107   : > { %2521 = vmatpush3.msra.mxu0 %v1815_v61  ;;  %2580 = vmatpush3.msra.mxu1 %v1815_v61 }
 0x108   : > { %v694_v47 = vpop.permute.xlu1 %693  ;;  %v692_v37 = vpop.permute.xlu0 %691  ;;  %2522 = vmatprep.subr.mxu0 %v1814_v62  ;;  %2576 = vmatprep.subr.mxu1 %v1814_v62 }
 0x109   : > { %787 = vst.msk [vmem:[#allocation2 + $0x18] sm:$0xff] %vm783_vm3, %v694_v47  ;;  %786 = vst.msk [vmem:[#allocation2 + $0x10] sm:$0xff] %vm783_vm3, %v692_v37  ;;  %2523 = vmatpush3.msra.mxu0 %v1814_v62  ;;  %2581 = vmatpush3.msra.mxu1 %v1814_v62  ;;  %v2335_v47 = vld [vmem:[%s2649_s17 + $0x12a] sm:$0xff] }
 0x10a   : > { %918 = vrot.lane.b32.xlu1 %v2858_v46, %s2610_s21  ;;  %1685 = vrot.lane.b32.xlu0 %v2991_v59, %s2614_s29 }
 0x10c   : > { %v698_v12 = vpop.permute.xlu1 %697  ;;  %v696_v16 = vpop.permute.xlu0 %695 }
 0x10d   : > { %789 = vst.msk [vmem:[#allocation2 + $0x28] sm:$0xff] %vm783_vm3, %v698_v12  ;;  %788 = vst.msk [vmem:[#allocation2 + $0x20] sm:$0xff] %vm783_vm3, %v696_v16 }
 0x10e   : > { %1109 = vrot.lane.b32.xlu1 %v2991_v59, %s2611_s22  ;;  %1077 = vrot.lane.b32.xlu0 %v2941_v21, %s2611_s22 }
 0x110   : > { %v702_v46 = vpop.permute.xlu1 %701  ;;  %v700_v63 = vpop.permute.xlu0 %699 }
 0x111   : > { %791 = vst.msk [vmem:[#allocation2 + $0x38] sm:$0xff] %vm783_vm3, %v702_v46  ;;  %790 = vst.msk [vmem:[#allocation2 + $0x30] sm:$0xff] %vm783_vm3, %v700_v63  ;;  %v2398_v63 = vld [vmem:[%s2649_s17 + $0x139] sm:$0xff] }
 0x112   : > { %1687 = vrot.lane.b32.xlu1 %v2988_v58, %s2614_s29  ;;  %1655 = vrot.lane.b32.xlu0 %v2938_v18, %s2614_s29 }
 0x114   : > { %v706_v3 = vpop.permute.xlu1 %705  ;;  %v704_v29 = vpop.permute.xlu0 %703 }
 0x115   : > { %793 = vst.msk [vmem:[#allocation2 + $0x48] sm:$0xff] %vm783_vm3, %v706_v3  ;;  %792 = vst.msk [vmem:[#allocation2 + $0x40] sm:$0xff] %vm783_vm3, %v704_v29  ;;  %v2383_v29 = vld [vmem:[%s2649_s17 + $0x81] sm:$0xff] }
 0x116   : > { %1111 = vrot.lane.b32.xlu1 %v2988_v58, %s2611_s22  ;;  %1079 = vrot.lane.b32.xlu0 %v2938_v18, %s2611_s22 }
 0x118   : > { %v710_v21 = vpop.permute.xlu1 %709  ;;  %v708_v59 = vpop.permute.xlu0 %707 }
 0x119   : > { %795 = vst.msk [vmem:[#allocation2 + $0x58] sm:$0xff] %vm783_vm3, %v710_v21  ;;  %794 = vst.msk [vmem:[#allocation2 + $0x50] sm:$0xff] %vm783_vm3, %v708_v59  ;;  %v2399_v59 = vld [vmem:[%s2649_s17 + $0x141] sm:$0xff] }
 0x11a   : > { %1303 = vrot.lane.b32.xlu1 %v2827_v41, %s2612_s23  ;;  %1271 = vrot.lane.b32.xlu0 %v2747_v23, %s2612_s23  ;;  %v3821_v23 = vld [vmem:[#allocation4_spill] sm:$0xff] }
 0x11c   : > { %v714_v60 = vpop.permute.xlu1 %713  ;;  %v712_v1 = vpop.permute.xlu0 %711 }
 0x11d   : > { %797 = vst.msk [vmem:[#allocation2 + $0x68] sm:$0xff] %vm783_vm3, %v714_v60  ;;  %796 = vst.msk [vmem:[#allocation2 + $0x60] sm:$0xff] %vm783_vm3, %v712_v1 }
 0x11e   : > { %1305 = vrot.lane.b32.xlu1 %v2824_v40, %s2612_s23  ;;  %1273 = vrot.lane.b32.xlu0 %v2742_v22, %s2612_s23 }
 0x120   : > { %v718_v18 = vpop.permute.xlu1 %717  ;;  %v716_v58 = vpop.permute.xlu0 %715 }
 0x121   : > { %799 = vst.msk [vmem:[#allocation2 + $0x78] sm:$0xff] %vm783_vm3, %v718_v18  ;;  %798 = vst.msk [vmem:[#allocation2 + $0x70] sm:$0xff] %vm783_vm3, %v716_v58  ;;  %v2430_v18 = vld [vmem:[%s2649_s17 + $0x13a] sm:$0xff] }
 0x122   : > { %1496 = vrot.lane.b32.xlu1 %v3821_v23, %s2613_s24  ;;  %1464 = vrot.lane.b32.xlu0 %v2679_v7, %s2613_s24  ;;  %v3822_v7 = vld [vmem:[#allocation6_spill] sm:$0xff] }
 0x124   : > { %v722_v41 = vpop.permute.xlu1 %721  ;;  %v720_v50 = vpop.permute.xlu0 %719 }
 0x125   : > { %801 = vst.msk [vmem:[#allocation2 + $0x88] sm:$0xff] %vm783_vm3, %v722_v41  ;;  %800 = vst.msk [vmem:[#allocation2 + $0x80] sm:$0xff] %vm783_vm3, %v720_v50 }
 0x126   : > { %1466 = vrot.lane.b32.xlu1 %v2676_v6, %s2613_s24  ;;  %920 = vrot.lane.b32.xlu0 %v3821_v23, %s2610_s21  ;;  %v3824_v6 = vld [vmem:[#allocation8_spill] sm:$0xff] }
 0x128   : > { %v726_v22 = vpop.permute.xlu1 %725  ;;  %v724_v40 = vpop.permute.xlu0 %723 }
 0x129   : > { %803 = vst.msk [vmem:[#allocation2 + $0x98] sm:$0xff] %vm783_vm3, %v726_v22  ;;  %802 = vst.msk [vmem:[#allocation2 + $0x90] sm:$0xff] %vm783_vm3, %v724_v40  ;;  %v2431_v22 = vld [vmem:[%s2649_s17 + $0x142] sm:$0xff] }
 0x12a   : > { %1657 = vrot.lane.b32.xlu1 %v3822_v7, %s2614_s29  ;;  %1498 = vrot.lane.b32.xlu0 %v3823_v51, %s2613_s24  ;;  %v2415_v40 = vld [vmem:[%s2649_s17 + $0x82] sm:$0xff] }
 0x12c   : > { %v730_v30 = vpop.permute.xlu1 %729  ;;  %v728_v56 = vpop.permute.xlu0 %727 }
 0x12d   : > { %805 = vst.msk [vmem:[#allocation2 + $0xa8] sm:$0xff] %vm783_vm3, %v730_v30  ;;  %804 = vst.msk [vmem:[#allocation2 + $0xa0] sm:$0xff] %vm783_vm3, %v728_v56 }
 0x12e   : > { %922 = vrot.lane.b32.xlu1 %v3823_v51, %s2610_s21  ;;  %1689 = vrot.lane.b32.xlu0 %v3824_v6, %s2614_s29 }
 0x130   : > { %v734_v57 = vpop.permute.xlu1 %733  ;;  %v732_v28 = vpop.permute.xlu0 %731 }
 0x131   : > { %807 = vst.msk [vmem:[#allocation2 + $0xb8] sm:$0xff] %vm783_vm3, %v734_v57  ;;  %806 = vst.msk [vmem:[#allocation2 + $0xb0] sm:$0xff] %vm783_vm3, %v732_v28  ;;  %v2352_v57 = vld [vmem:[%s2649_s17 + $0x90] sm:$0xff] }
 0x132   : > { %1113 = vrot.lane.b32.xlu1 %v3824_v6, %s2611_s22  ;;  %1081 = vrot.lane.b32.xlu0 %v3822_v7, %s2611_s22 }
 0x134   : > { %v738_v31 = vpop.permute.xlu1 %737  ;;  %v736_v0 = vpop.permute.xlu0 %735 }
 0x135   : > { %809 = vst.msk [vmem:[#allocation2 + $0xc8] sm:$0xff] %vm783_vm3, %v738_v31  ;;  %808 = vst.msk [vmem:[#allocation2 + $0xc0] sm:$0xff] %vm783_vm3, %v736_v0 }
 0x136   : > { %1691 = vrot.lane.b32.xlu1 %v3825_v2, %s2614_s29  ;;  %1659 = vrot.lane.b32.xlu0 %v3826_v32, %s2614_s29 }
 0x138   : > { %v742_v33 = vpop.permute.xlu1 %741  ;;  %v740_v34 = vpop.permute.xlu0 %739 }
 0x139   : > { %811 = vst.msk [vmem:[#allocation2 + $0xd8] sm:$0xff] %vm783_vm3, %v742_v33  ;;  %810 = vst.msk [vmem:[#allocation2 + $0xd0] sm:$0xff] %vm783_vm3, %v740_v34  ;;  %v2400_v34 = vld [vmem:[%s2649_s17 + $0x151] sm:$0xff] }
 0x13a   : > { %1115 = vrot.lane.b32.xlu1 %v3825_v2, %s2611_s22  ;;  %1083 = vrot.lane.b32.xlu0 %v3826_v32, %s2611_s22  ;;  %v2353_v2 = vld [vmem:[%s2649_s17 + $0x98] sm:$0xff] }
 0x13c   : > { %v746_v35 = vpop.permute.xlu1 %745  ;;  %v744_v8 = vpop.permute.xlu0 %743 }
 0x13d   : > { %813 = vst.msk [vmem:[#allocation2 + $0xe8] sm:$0xff] %vm783_vm3, %v746_v35  ;;  %812 = vst.msk [vmem:[#allocation2 + $0xe0] sm:$0xff] %vm783_vm3, %v744_v8  ;;  %v2384_v35 = vld [vmem:[%s2649_s17 + $0x91] sm:$0xff] }
 0x13e   : > { %1307 = vrot.lane.b32.xlu1 %v2847_v45, %s2612_s23  ;;  %1275 = vrot.lane.b32.xlu0 %v2753_v25, %s2612_s23  ;;  %v2380_v45 = vld [vmem:[%s2649_s17 + $0x61] sm:$0xff] }
 0x140   : > { %v750_v9 = vpop.permute.xlu1 %749  ;;  %v748_v10 = vpop.permute.xlu0 %747 }
 0x141   : > { %815 = vst.msk [vmem:[#allocation2 + $0xf8] sm:$0xff] %vm783_vm3, %v750_v9  ;;  %814 = vst.msk [vmem:[#allocation2 + $0xf0] sm:$0xff] %vm783_vm3, %v748_v10 }
 0x142   : > { %1309 = vrot.lane.b32.xlu1 %v2844_v44, %s2612_s23  ;;  %1277 = vrot.lane.b32.xlu0 %v2750_v24, %s2612_s23  ;;  %v2412_v24 = vld [vmem:[%s2649_s17 + $0x62] sm:$0xff] }
 0x144   : > { %v883_v14 = vpop.permute.xlu1 %882  ;;  %v881_v25 = vpop.permute.xlu0 %880 }
 0x145   : > { %978 = vst.msk [vmem:[#allocation2 + $0x8] sm:$0xff] %vm976_vm5, %v883_v14  ;;  %977 = vst.msk [vmem:[#allocation2] sm:$0xff] %vm976_vm5, %v881_v25  ;;  %v2416_v14 = vld [vmem:[%s2649_s17 + $0x92] sm:$0xff] }
 0x146   : > { %1500 = vrot.lane.b32.xlu1 %v2396_v11, %s2613_s24  ;;  %1468 = vrot.lane.b32.xlu0 %v2380_v45, %s2613_s24  ;;  %v2401_v25 = vld [vmem:[%s2649_s17 + $0x159] sm:$0xff] }
 0x148   : > { %v887_v44 = vpop.permute.xlu1 %886  ;;  %v885_v42 = vpop.permute.xlu0 %884 }
 0x149   : > { %980 = vst.msk [vmem:[#allocation2 + $0x18] sm:$0xff] %vm976_vm5, %v887_v44  ;;  %979 = vst.msk [vmem:[#allocation2 + $0x10] sm:$0xff] %vm976_vm5, %v885_v42  ;;  %v2432_v42 = vld [vmem:[%s2649_s17 + $0x152] sm:$0xff] }
 0x14a   : > { %1470 = vrot.lane.b32.xlu1 %v2381_v15, %s2613_s24  ;;  %924 = vrot.lane.b32.xlu0 %v2396_v11, %s2610_s21 }
 0x14c   : > { %v891_v17 = vpop.permute.xlu1 %890  ;;  %v889_v55 = vpop.permute.xlu0 %888 }
 0x14d   : > { %982 = vst.msk [vmem:[#allocation2 + $0x28] sm:$0xff] %vm976_vm5, %v891_v17  ;;  %981 = vst.msk [vmem:[#allocation2 + $0x20] sm:$0xff] %vm976_vm5, %v889_v55 }
 0x14e   : > { %1661 = vrot.lane.b32.xlu1 %v2412_v24, %s2614_s29  ;;  %1502 = vrot.lane.b32.xlu0 %v2397_v43, %s2613_s24 }
 0x150   : > { %v895_v13 = vpop.permute.xlu1 %894  ;;  %v893_v54 = vpop.permute.xlu0 %892 }
 0x151   : > { %984 = vst.msk [vmem:[#allocation2 + $0x38] sm:$0xff] %vm976_vm5, %v895_v13  ;;  %983 = vst.msk [vmem:[#allocation2 + $0x30] sm:$0xff] %vm976_vm5, %v893_v54  ;;  %v2433_v13 = vld [vmem:[%s2649_s17 + $0x15a] sm:$0xff] }
 0x152   : > { %926 = vrot.lane.b32.xlu1 %v2397_v43, %s2610_s21  ;;  %1693 = vrot.lane.b32.xlu0 %v3827_v20, %s2614_s29  ;;  %v2417_v54 = vld [vmem:[%s2649_s17 + $0x9a] sm:$0xff] }
 0x154   : > { %v899_v39 = vpop.permute.xlu1 %898  ;;  %v897_v19 = vpop.permute.xlu0 %896 }
 0x155   : > { %986 = vst.msk [vmem:[#allocation2 + $0x48] sm:$0xff] %vm976_vm5, %v899_v39  ;;  %985 = vst.msk [vmem:[#allocation2 + $0x40] sm:$0xff] %vm976_vm5, %v897_v19 }
 0x156   : > { %1117 = vrot.lane.b32.xlu1 %v3827_v20, %s2611_s22  ;;  %1085 = vrot.lane.b32.xlu0 %v2412_v24, %s2611_s22 }
 0x158   : > { %v903_v38 = vpop.permute.xlu1 %902  ;;  %v901_v36 = vpop.permute.xlu0 %900 }
 0x159   : > { %988 = vst.msk [vmem:[#allocation2 + $0x58] sm:$0xff] %vm976_vm5, %v903_v38  ;;  %987 = vst.msk [vmem:[#allocation2 + $0x50] sm:$0xff] %vm976_vm5, %v901_v36  ;;  %v2370_v36 = vld [vmem:[%s2649_s17 + $0x168] sm:$0xff] }
 0x15a   : > { %1695 = vrot.lane.b32.xlu1 %v3828_v4, %s2614_s29  ;;  %1663 = vrot.lane.b32.xlu0 %v2413_v5, %s2614_s29  ;;  %v2354_v4 = vld [vmem:[%s2649_s17 + $0xa8] sm:$0xff] }
 0x15c   : > { %v915_v37 = vpop.permute.xlu1 %914  ;;  %v913_v61 = vpop.permute.xlu0 %912 }
 0x15d   : > { %994 = vst.msk [vmem:[#allocation2 + $0x88] sm:$0xff] %vm976_vm5, %v915_v37  ;;  %993 = vst.msk [vmem:[#allocation2 + $0x80] sm:$0xff] %vm976_vm5, %v913_v61 }
 0x15e   : > { %1119 = vrot.lane.b32.xlu1 %v2335_v47, %s2611_s22  ;;  %1087 = vrot.lane.b32.xlu0 %v2413_v5, %s2611_s22 }
 0x160   : > { %v1106_v62 = vpop.permute.xlu1 %1105  ;;  %v1074_v12 = vpop.permute.xlu0 %1073 }
 0x161   : > { %1186 = vst.msk [vmem:[#allocation2 + $0x80] sm:$0xff] %vm1169_vm6, %v1106_v62  ;;  %1170 = vst.msk [vmem:[#allocation2] sm:$0xff] %vm1169_vm6, %v1074_v12  ;;  %v2371_v62 = vld [vmem:[%s2649_s17 + $0x170] sm:$0xff] }
 0x162   : > { %1311 = vrot.lane.b32.xlu1 %v2867_v49, %s2612_s23  ;;  %1279 = vrot.lane.b32.xlu0 %v2765_v27, %s2612_s23  ;;  %v2382_v49 = vld [vmem:[%s2649_s17 + $0x79] sm:$0xff]  ;;  %v2355_v12 = vld [vmem:[%s2649_s17 + $0xb0] sm:$0xff] }
 0x164   : > { %v1108_v16 = vpop.permute.xlu1 %1107  ;;  %v1076_v46 = vpop.permute.xlu0 %1075 }
 0x165   : > { %1187 = vst.msk [vmem:[#allocation2 + $0x88] sm:$0xff] %vm1169_vm6, %v1108_v16  ;;  %1171 = vst.msk [vmem:[#allocation2 + $0x8] sm:$0xff] %vm1169_vm6, %v1076_v46 }
 0x166   : > { %1313 = vrot.lane.b32.xlu1 %v2864_v48, %s2612_s23  ;;  %1281 = vrot.lane.b32.xlu0 %v2762_v26, %s2612_s23  ;;  %v2414_v26 = vld [vmem:[%s2649_s17 + $0x7a] sm:$0xff] }
 0x168   : > { %v1300_v3 = vpop.permute.xlu1 %1299  ;;  %v1268_v27 = vpop.permute.xlu0 %1267 }
 0x169   : > { %1380 = vst.msk [vmem:[#allocation2 + $0x80] sm:$0xff] %vm1363_vm7, %v1300_v3  ;;  %1364 = vst.msk [vmem:[#allocation2] sm:$0xff] %vm1363_vm7, %v1268_v27 }
 0x16a   : > { %1504 = vrot.lane.b32.xlu1 %v2398_v63, %s2613_s24  ;;  %1472 = vrot.lane.b32.xlu0 %v2382_v49, %s2613_s24  ;;  %v2386_v49 = vld [vmem:[%s2649_s17 + $0xa9] sm:$0xff] }
 0x16c   : > { %v1302_v48 = vpop.permute.xlu1 %1301  ;;  %v1270_v21 = vpop.permute.xlu0 %1269 }
 0x16d   : > { %1381 = vst.msk [vmem:[#allocation2 + $0x88] sm:$0xff] %vm1363_vm7, %v1302_v48  ;;  %1365 = vst.msk [vmem:[#allocation2 + $0x8] sm:$0xff] %vm1363_vm7, %v1270_v21 }
 0x16e   : > { %1474 = vrot.lane.b32.xlu1 %v2383_v29, %s2613_s24  ;;  %928 = vrot.lane.b32.xlu0 %v2398_v63, %s2610_s21  ;;  %v2402_v63 = vld [vmem:[%s2649_s17 + $0x169] sm:$0xff] }
 0x170   : > { %v1493_v60 = vpop.permute.xlu1 %1492  ;;  %v1461_v1 = vpop.permute.xlu0 %1460 }
 0x171   : > { %1573 = vst.msk [vmem:[#allocation2 + $0x80] sm:$0xff] %vm1556_vm8, %v1493_v60  ;;  %1557 = vst.msk [vmem:[#allocation2] sm:$0xff] %vm1556_vm8, %v1461_v1  ;;  %v2387_v60 = vld [vmem:[%s2649_s17 + $0xb1] sm:$0xff] }
 0x172   : > { %1665 = vrot.lane.b32.xlu1 %v2414_v26, %s2614_s29  ;;  %1506 = vrot.lane.b32.xlu0 %v2399_v59, %s2613_s24 }
 0x174   : > { %v1463_v58 = vpop.permute.xlu1 %1462  ;;  %v917_v23 = vpop.permute.xlu0 %916 }
 0x175   : > { %1558 = vst.msk [vmem:[#allocation2 + $0x8] sm:$0xff] %vm1556_vm8, %v1463_v58  ;;  %v2434_v58 = vld [vmem:[%s2649_s17 + $0x16a] sm:$0xff] }
 0x176   : > { %995 = vst.msk [vmem:[#allocation2 + $0x90] sm:$0xff] %vm976_vm5, %v917_v23  ;;  %930 = vrot.lane.b32.xlu1 %v2399_v59, %s2610_s21  ;;  %1697 = vrot.lane.b32.xlu0 %v2430_v18, %s2614_s29  ;;  %v2403_v59 = vld [vmem:[%s2649_s17 + $0x171] sm:$0xff] }
 0x177   : > { %v2418_v23 = vld [vmem:[%s2649_s17 + $0xaa] sm:$0xff] }
 0x178   : > { %v1654_v41 = vpop.permute.xlu1 %1653  ;;  %v1495_v50 = vpop.permute.xlu0 %1494 }
 0x179   : > { %1750 = vst.msk [vmem:[#allocation2] sm:$0xff] %vm1749_vm9, %v1654_v41 }
 0x17a   : > { %1574 = vst.msk [vmem:[#allocation2 + $0x88] sm:$0xff] %vm1556_vm8, %v1495_v50  ;;  %1121 = vrot.lane.b32.xlu1 %v2430_v18, %s2611_s22  ;;  %1089 = vrot.lane.b32.xlu0 %v2414_v26, %s2611_s22 }
 0x17c   : > { %v919_v7 = vpop.permute.xlu1 %918  ;;  %v1686_v51 = vpop.permute.xlu0 %1685 }
 0x17d   : > { %996 = vst.msk [vmem:[#allocation2 + $0x98] sm:$0xff] %vm976_vm5, %v919_v7 }
 0x17e   : > { %1766 = vst.msk [vmem:[#allocation2 + $0x80] sm:$0xff] %vm1749_vm9, %v1686_v51  ;;  %1699 = vrot.lane.b32.xlu1 %v2431_v22, %s2614_s29  ;;  %1667 = vrot.lane.b32.xlu0 %v2415_v40, %s2614_s29 }
 0x180   : > { %v1110_v30 = vpop.permute.xlu1 %1109  ;;  %v1078_v56 = vpop.permute.xlu0 %1077  ;;  %v1782_v6 = vld [vmem:[#allocation2] sm:$0xff] }
 0x181   : > { %1188 = vst.msk [vmem:[#allocation2 + $0x90] sm:$0xff] %vm1169_vm6, %v1110_v30  ;;  %1172 = vst.msk [vmem:[#allocation2 + $0x10] sm:$0xff] %vm1169_vm6, %v1078_v56  ;;  %2524 = vmatprep.mubr.msk.f32.mxu0 %vm1826_vm10, %v1782_v6  ;;  %v2435_v30 = vld [vmem:[%s2649_s17 + $0x172] sm:$0xff] }
 0x182   : > { %1123 = vrot.lane.b32.xlu1 %v2431_v22, %s2611_s22  ;;  %1091 = vrot.lane.b32.xlu0 %v2415_v40, %s2611_s22  ;;  %v2419_v56 = vld [vmem:[%s2649_s17 + $0xb2] sm:$0xff] }
 0x184   : > { %v1688_v28 = vpop.permute.xlu1 %1687  ;;  %v1656_v31 = vpop.permute.xlu0 %1655 }
 0x185   : > { %v1798_v0 = vld [vmem:[#allocation2 + $0x80] sm:$0xff]  ;;  %1767 = vst.msk [vmem:[#allocation2 + $0x88] sm:$0xff] %vm1749_vm9, %v1688_v28  ;;  %1751 = vst.msk [vmem:[#allocation2 + $0x8] sm:$0xff] %vm1749_vm9, %v1656_v31 }
 0x186   : > { %2548 = vmatprep.mubr.msk.f32.mxu1 %vm1826_vm10, %v1798_v0  ;;  %1315 = vrot.lane.b32.xlu1 %v2887_v53, %s2612_s23 }
 0x187   : > { %1283 = vrot.lane.b32.xlu0 %v2352_v57, %s2612_s23 }
 0x188   : > { %v1112_v32 = vpop.permute.xlu1 %1111  ;;  %v1080_v33 = vpop.permute.xlu0 %1079 }
 0x189   : > { %1189 = vst.msk [vmem:[#allocation2 + $0x98] sm:$0xff] %vm1169_vm6, %v1112_v32  ;;  %1173 = vst.msk [vmem:[#allocation2 + $0x18] sm:$0xff] %vm1169_vm6, %v1080_v33  ;;  %v2372_v32 = vld [vmem:[%s2649_s17 + $0x180] sm:$0xff] }
 0x18a   : > { %1317 = vrot.lane.b32.xlu1 %v2884_v52, %s2612_s23  ;;  %v2385_v52 = vld [vmem:[%s2649_s17 + $0x99] sm:$0xff] }
 0x18b   : > { %1285 = vrot.lane.b32.xlu0 %v2353_v2, %s2612_s23  ;;  %v2356_v33 = vld [vmem:[%s2649_s17 + $0xc0] sm:$0xff] }
 0x18c   : > { %v1304_v8 = vpop.permute.xlu1 %1303  ;;  %v1272_v9 = vpop.permute.xlu0 %1271  ;;  %v1783_v53 = vld [vmem:[#allocation2 + $0x8] sm:$0xff] }
 0x18d   : > { %v1799_v10 = vld [vmem:[#allocation2 + $0x88] sm:$0xff]  ;;  %1382 = vst.msk [vmem:[#allocation2 + $0x90] sm:$0xff] %vm1363_vm7, %v1304_v8  ;;  %1366 = vst.msk [vmem:[#allocation2 + $0x10] sm:$0xff] %vm1363_vm7, %v1272_v9  ;;  %2525 = vmatmul.mubr.msk.f32.vlgmr.msra.gmra.mxu0 %vm1826_vm10, %v1783_v53 }
 0x18e   : > { %2549 = vmatmul.mubr.msk.f32.vlgmr.msra.gmra.mxu1 %vm1826_vm10, %v1799_v10  ;;  %1508 = vrot.lane.b32.xlu1 %v2400_v34, %s2613_s24  ;;  %v2373_v8 = vld [vmem:[%s2649_s17 + $0x188] sm:$0xff] }
 0x18f   : > { %1476 = vrot.lane.b32.xlu0 %v2384_v35, %s2613_s24  ;;  %v2357_v9 = vld [vmem:[%s2649_s17 + $0xc8] sm:$0xff] }
 0x190   : > { %v1306_v11 = vpop.permute.xlu1 %1305  ;;  %v1274_v45 = vpop.permute.xlu0 %1273 }
 0x191   : > { %1383 = vst.msk [vmem:[#allocation2 + $0x98] sm:$0xff] %vm1363_vm7, %v1306_v11  ;;  %1367 = vst.msk [vmem:[#allocation2 + $0x18] sm:$0xff] %vm1363_vm7, %v1274_v45  ;;  %v2404_v45 = vld [vmem:[%s2649_s17 + $0x181] sm:$0xff] }
 0x192   : > { %1478 = vrot.lane.b32.xlu1 %v2385_v52, %s2613_s24 }
 0x193   : > { %932 = vrot.lane.b32.xlu0 %v2400_v34, %s2610_s21 }
 0x194   : > { %v1497_v15 = vpop.permute.xlu1 %1496  ;;  %v1465_v44 = vpop.permute.xlu0 %1464 }
 0x195   : > { %1575 = vst.msk [vmem:[#allocation2 + $0x90] sm:$0xff] %vm1556_vm8, %v1497_v15  ;;  %1559 = vst.msk [vmem:[#allocation2 + $0x10] sm:$0xff] %vm1556_vm8, %v1465_v44 }
 0x196   : > { %1669 = vrot.lane.b32.xlu1 %v2416_v14, %s2614_s29 }
 0x197   : > { %1510 = vrot.lane.b32.xlu0 %v2401_v25, %s2613_s24 }
 0x198   : > { %v1467_v24 = vpop.permute.xlu1 %1466  ;;  %v921_v43 = vpop.permute.xlu0 %920 }
 0x199   : > { %1560 = vst.msk [vmem:[#allocation2 + $0x18] sm:$0xff] %vm1556_vm8, %v1467_v24  ;;  %v2405_v24 = vld [vmem:[%s2649_s17 + $0x189] sm:$0xff] }
 0x19a   : > { %997 = vst.msk [vmem:[#allocation2 + $0xa0] sm:$0xff] %vm976_vm5, %v921_v43  ;;  %934 = vrot.lane.b32.xlu1 %v2401_v25, %s2610_s21  ;;  %v2389_v43 = vld [vmem:[%s2649_s17 + $0xc9] sm:$0xff] }
 0x19b   : > { %1701 = vrot.lane.b32.xlu0 %v2432_v42, %s2614_s29 }
 0x19c   : > { %v1658_v17 = vpop.permute.xlu1 %1657  ;;  %v1499_v55 = vpop.permute.xlu0 %1498 }
 0x19d   : > { %1752 = vst.msk [vmem:[#allocation2 + $0x10] sm:$0xff] %vm1749_vm9, %v1658_v17 }
 0x19e   : > { %1576 = vst.msk [vmem:[#allocation2 + $0x98] sm:$0xff] %vm1556_vm8, %v1499_v55  ;;  %1125 = vrot.lane.b32.xlu1 %v2432_v42, %s2611_s22 }
 0x19f   : > { %1093 = vrot.lane.b32.xlu0 %v2416_v14, %s2611_s22  ;;  %v2388_v14 = vld [vmem:[%s2649_s17 + $0xc1] sm:$0xff] }
 0x1a0   : > { %v923_v20 = vpop.permute.xlu1 %922  ;;  %v1690_v39 = vpop.permute.xlu0 %1689 }
 0x1a1   : > { %998 = vst.msk [vmem:[#allocation2 + $0xa8] sm:$0xff] %vm976_vm5, %v923_v20 }
 0x1a2   : > { %1768 = vst.msk [vmem:[#allocation2 + $0x90] sm:$0xff] %vm1749_vm9, %v1690_v39  ;;  %1703 = vrot.lane.b32.xlu1 %v2433_v13, %s2614_s29 }
 0x1a3   : > { %1671 = vrot.lane.b32.xlu0 %v2417_v54, %s2614_s29 }
 0x1a4   : > { %v1114_v19 = vpop.permute.xlu1 %1113  ;;  %v1082_v5 = vpop.permute.xlu0 %1081  ;;  %v1784_v38 = vld [vmem:[#allocation2 + $0x10] sm:$0xff] }
 0x1a5   : > { %1190 = vst.msk [vmem:[#allocation2 + $0xa0] sm:$0xff] %vm1169_vm6, %v1114_v19  ;;  %1174 = vst.msk [vmem:[#allocation2 + $0x20] sm:$0xff] %vm1169_vm6, %v1082_v5  ;;  %2527 = vmatprep.mubr.msk.f32.mxu0 %vm1826_vm10, %v1784_v38 }
 0x1a6   : > { %1127 = vrot.lane.b32.xlu1 %v2433_v13, %s2611_s22  ;;  %v2436_v13 = vld [vmem:[%s2649_s17 + $0x182] sm:$0xff] }
 0x1a7   : > { %1095 = vrot.lane.b32.xlu0 %v2417_v54, %s2611_s22  ;;  %v2420_v54 = vld [vmem:[%s2649_s17 + $0xc2] sm:$0xff] }
 0x1a8   : > { %v1692_v47 = vpop.permute.xlu1 %1691  ;;  %v1660_v37 = vpop.permute.xlu0 %1659 }
 0x1a9   : > { %v1800_v61 = vld [vmem:[#allocation2 + $0x90] sm:$0xff]  ;;  %1769 = vst.msk [vmem:[#allocation2 + $0x98] sm:$0xff] %vm1749_vm9, %v1692_v47  ;;  %1753 = vst.msk [vmem:[#allocation2 + $0x18] sm:$0xff] %vm1749_vm9, %v1660_v37 }
 0x1aa   : > { %2551 = vmatprep.mubr.msk.f32.mxu1 %vm1826_vm10, %v1800_v61  ;;  %1319 = vrot.lane.b32.xlu1 %v2370_v36, %s2612_s23  ;;  %v2437_v47 = vld [vmem:[%s2649_s17 + $0x18a] sm:$0xff] }
 0x1ab   : > { %1287 = vrot.lane.b32.xlu0 %v2354_v4, %s2612_s23  ;;  %v2421_v37 = vld [vmem:[%s2649_s17 + $0xca] sm:$0xff] }
 0x1ac   : > { %v1116_v16 = vpop.permute.xlu1 %1115  ;;  %v1084_v46 = vpop.permute.xlu0 %1083 }
 0x1ad   : > { %1191 = vst.msk [vmem:[#allocation2 + $0xa8] sm:$0xff] %vm1169_vm6, %v1116_v16  ;;  %1175 = vst.msk [vmem:[#allocation2 + $0x28] sm:$0xff] %vm1169_vm6, %v1084_v46 }
 0x1ae   : > { %1321 = vrot.lane.b32.xlu1 %v2371_v62, %s2612_s23 }
 0x1af   : > { %1289 = vrot.lane.b32.xlu0 %v2355_v12, %s2612_s23 }
 0x1b0   : > { %v1308_v3 = vpop.permute.xlu1 %1307  ;;  %v1276_v27 = vpop.permute.xlu0 %1275  ;;  %v1785_v29 = vld [vmem:[#allocation2 + $0x18] sm:$0xff] }
 0x1b1   : > { %v1801_v48 = vld [vmem:[#allocation2 + $0x98] sm:$0xff]  ;;  %1384 = vst.msk [vmem:[#allocation2 + $0xa0] sm:$0xff] %vm1363_vm7, %v1308_v3  ;;  %1368 = vst.msk [vmem:[#allocation2 + $0x20] sm:$0xff] %vm1363_vm7, %v1276_v27  ;;  %2528 = vmatmul.mubr.msk.f32.gmra.mxu0 %vm1826_vm10, %v1785_v29 }
 0x1b2   : > { %2552 = vmatmul.mubr.msk.f32.gmra.mxu1 %vm1826_vm10, %v1801_v48  ;;  %1512 = vrot.lane.b32.xlu1 %v2402_v63, %s2613_s24 }
 0x1b3   : > { %1480 = vrot.lane.b32.xlu0 %v2386_v49, %s2613_s24 }
 0x1b4   : > { %v1310_v21 = vpop.permute.xlu1 %1309  ;;  %v1278_v26 = vpop.permute.xlu0 %1277 }
 0x1b5   : > { %1385 = vst.msk [vmem:[#allocation2 + $0xa8] sm:$0xff] %vm1363_vm7, %v1310_v21  ;;  %1369 = vst.msk [vmem:[#allocation2 + $0x28] sm:$0xff] %vm1363_vm7, %v1278_v26  ;;  %v2375_v21 = vld [vmem:[%s2649_s17 + $0x1a0] sm:$0xff] }
 0x1b6   : > { %936 = vrot.lane.b32.xlu1 %v2402_v63, %s2610_s21  ;;  %v2374_v63 = vld [vmem:[%s2649_s17 + $0x198] sm:$0xff]  ;;  %v2359_v26 = vld [vmem:[%s2649_s17 + $0xe0] sm:$0xff] }
 0x1b7   : > { %904 = vrot.lane.b32.xlu0 %v2386_v49, %s2610_s21  ;;  %v2358_v49 = vld [vmem:[%s2649_s17 + $0xd8] sm:$0xff] }
 0x1b8   : > { %v1501_v1 = vpop.permute.xlu1 %1500  ;;  %v1469_v18 = vpop.permute.xlu0 %1468 }
 0x1b9   : > { %1577 = vst.msk [vmem:[#allocation2 + $0xa0] sm:$0xff] %vm1556_vm8, %v1501_v1  ;;  %1561 = vst.msk [vmem:[#allocation2 + $0x20] sm:$0xff] %vm1556_vm8, %v1469_v18  ;;  %v2406_v1 = vld [vmem:[%s2649_s17 + $0x199] sm:$0xff] }
 0x1ba   : > { %1514 = vrot.lane.b32.xlu1 %v2403_v59, %s2613_s24  ;;  %v2390_v18 = vld [vmem:[%s2649_s17 + $0xd9] sm:$0xff] }
 0x1bb   : > { %1482 = vrot.lane.b32.xlu0 %v2387_v60, %s2613_s24 }
 0x1bc   : > { %v1471_v41 = vpop.permute.xlu1 %1470  ;;  %v925_v50 = vpop.permute.xlu0 %924 }
 0x1bd   : > { %1562 = vst.msk [vmem:[#allocation2 + $0x28] sm:$0xff] %vm1556_vm8, %v1471_v41  ;;  %v2407_v41 = vld [vmem:[%s2649_s17 + $0x1a1] sm:$0xff] }
 0x1be   : > { %999 = vst.msk [vmem:[#allocation2 + $0xb0] sm:$0xff] %vm976_vm5, %v925_v50  ;;  %1705 = vrot.lane.b32.xlu1 %v2434_v58, %s2614_s29  ;;  %v2391_v50 = vld [vmem:[%s2649_s17 + $0xe1] sm:$0xff] }
 0x1bf   : > { %1673 = vrot.lane.b32.xlu0 %v2418_v23, %s2614_s29 }
 0x1c0   : > { %v1662_v22 = vpop.permute.xlu1 %1661  ;;  %v1503_v40 = vpop.permute.xlu0 %1502 }
 0x1c1   : > { %1754 = vst.msk [vmem:[#allocation2 + $0x20] sm:$0xff] %vm1749_vm9, %v1662_v22 }
 0x1c2   : > { %1578 = vst.msk [vmem:[#allocation2 + $0xa8] sm:$0xff] %vm1556_vm8, %v1503_v40  ;;  %938 = vrot.lane.b32.xlu1 %v2403_v59, %s2610_s21 }
 0x1c3   : > { %906 = vrot.lane.b32.xlu0 %v2387_v60, %s2610_s21 }
 0x1c4   : > { %v927_v7 = vpop.permute.xlu1 %926  ;;  %v1694_v51 = vpop.permute.xlu0 %1693 }
 0x1c5   : > { %1000 = vst.msk [vmem:[#allocation2 + $0xb8] sm:$0xff] %vm976_vm5, %v927_v7  ;;  %v2438_v7 = vld [vmem:[%s2649_s17 + $0x19a] sm:$0xff] }
 0x1c6   : > { %1770 = vst.msk [vmem:[#allocation2 + $0xa0] sm:$0xff] %vm1749_vm9, %v1694_v51  ;;  %1129 = vrot.lane.b32.xlu1 %v2434_v58, %s2611_s22  ;;  %v2422_v51 = vld [vmem:[%s2649_s17 + $0xda] sm:$0xff] }
 0x1c7   : > { %1097 = vrot.lane.b32.xlu0 %v2418_v23, %s2611_s22 }
 0x1c8   : > { %v1118_v6 = vpop.permute.xlu1 %1117  ;;  %v1086_v57 = vpop.permute.xlu0 %1085  ;;  %v1786_v28 = vld [vmem:[#allocation2 + $0x20] sm:$0xff] }
 0x1c9   : > { %1192 = vst.msk [vmem:[#allocation2 + $0xb0] sm:$0xff] %vm1169_vm6, %v1118_v6  ;;  %1176 = vst.msk [vmem:[#allocation2 + $0x30] sm:$0xff] %vm1169_vm6, %v1086_v57  ;;  %2530 = vmatprep.mubr.msk.f32.mxu0 %vm1826_vm10, %v1786_v28  ;;  %v2439_v6 = vld [vmem:[%s2649_s17 + $0x1a2] sm:$0xff] }
 0x1ca   : > { %1707 = vrot.lane.b32.xlu1 %v2435_v30, %s2614_s29  ;;  %v2423_v57 = vld [vmem:[%s2649_s17 + $0xe2] sm:$0xff] }
 0x1cb   : > { %1675 = vrot.lane.b32.xlu0 %v2419_v56, %s2614_s29 }
 0x1cc   : > { %v1696_v31 = vpop.permute.xlu1 %1695  ;;  %v1664_v0 = vpop.permute.xlu0 %1663 }
 0x1cd   : > { %v1802_v2 = vld [vmem:[#allocation2 + $0xa0] sm:$0xff]  ;;  %1771 = vst.msk [vmem:[#allocation2 + $0xa8] sm:$0xff] %vm1749_vm9, %v1696_v31  ;;  %1755 = vst.msk [vmem:[#allocation2 + $0x28] sm:$0xff] %vm1749_vm9, %v1664_v0 }
 0x1ce   : > { %2554 = vmatprep.mubr.msk.f32.mxu1 %vm1826_vm10, %v1802_v2  ;;  %1131 = vrot.lane.b32.xlu1 %v2435_v30, %s2611_s22 }
 0x1cf   : > { %1099 = vrot.lane.b32.xlu0 %v2419_v56, %s2611_s22 }
 0x1d0   : > { %v1120_v34 = vpop.permute.xlu1 %1119  ;;  %v1088_v35 = vpop.permute.xlu0 %1087 }
 0x1d1   : > { %1193 = vst.msk [vmem:[#allocation2 + $0xb8] sm:$0xff] %vm1169_vm6, %v1120_v34  ;;  %1177 = vst.msk [vmem:[#allocation2 + $0x38] sm:$0xff] %vm1169_vm6, %v1088_v35 }
 0x1d2   : > { %1323 = vrot.lane.b32.xlu1 %v2372_v32, %s2612_s23 }
 0x1d3   : > { %1291 = vrot.lane.b32.xlu0 %v2356_v33, %s2612_s23 }
 0x1d4   : > { %v1312_v53 = vpop.permute.xlu1 %1311  ;;  %v1280_v10 = vpop.permute.xlu0 %1279  ;;  %v1787_v52 = vld [vmem:[#allocation2 + $0x28] sm:$0xff] }
 0x1d5   : > { %v1803_v11 = vld [vmem:[#allocation2 + $0xa8] sm:$0xff]  ;;  %1386 = vst.msk [vmem:[#allocation2 + $0xb0] sm:$0xff] %vm1363_vm7, %v1312_v53  ;;  %1370 = vst.msk [vmem:[#allocation2 + $0x30] sm:$0xff] %vm1363_vm7, %v1280_v10  ;;  %2531 = vmatmul.mubr.msk.f32.gmra.mxu0 %vm1826_vm10, %v1787_v52 }
 0x1d6   : > { %2555 = vmatmul.mubr.msk.f32.gmra.mxu1 %vm1826_vm10, %v1803_v11  ;;  %1325 = vrot.lane.b32.xlu1 %v2373_v8, %s2612_s23 }
 0x1d7   : > { %1293 = vrot.lane.b32.xlu0 %v2357_v9, %s2612_s23 }
 0x1d8   : > { %v1314_v25 = vpop.permute.xlu1 %1313  ;;  %v1282_v15 = vpop.permute.xlu0 %1281 }
 0x1d9   : > { %1387 = vst.msk [vmem:[#allocation2 + $0xb8] sm:$0xff] %vm1363_vm7, %v1314_v25  ;;  %1371 = vst.msk [vmem:[#allocation2 + $0x38] sm:$0xff] %vm1363_vm7, %v1282_v15 }
 0x1da   : > { %1516 = vrot.lane.b32.xlu1 %v2404_v45, %s2613_s24 }
 0x1db   : > { %1484 = vrot.lane.b32.xlu0 %v2388_v14, %s2613_s24 }
 0x1dc   : > { %v1505_v44 = vpop.permute.xlu1 %1504  ;;  %v1473_v42 = vpop.permute.xlu0 %1472 }
 0x1dd   : > { %1579 = vst.msk [vmem:[#allocation2 + $0xb0] sm:$0xff] %vm1556_vm8, %v1505_v44  ;;  %1563 = vst.msk [vmem:[#allocation2 + $0x30] sm:$0xff] %vm1556_vm8, %v1473_v42 }
 0x1de   : > { %940 = vrot.lane.b32.xlu1 %v2404_v45, %s2610_s21 }
 0x1df   : > { %908 = vrot.lane.b32.xlu0 %v2388_v14, %s2610_s21 }
 0x1e0   : > { %v1475_v17 = vpop.permute.xlu1 %1474  ;;  %v929_v55 = vpop.permute.xlu0 %928 }
 0x1e1   : > { %1564 = vst.msk [vmem:[#allocation2 + $0x38] sm:$0xff] %vm1556_vm8, %v1475_v17 }
 0x1e2   : > { %1001 = vst.msk [vmem:[#allocation2 + $0xc0] sm:$0xff] %vm976_vm5, %v929_v55  ;;  %1518 = vrot.lane.b32.xlu1 %v2405_v24, %s2613_s24 }
 0x1e3   : > { %1486 = vrot.lane.b32.xlu0 %v2389_v43, %s2613_s24 }
 0x1e4   : > { %v1666_v20 = vpop.permute.xlu1 %1665  ;;  %v1507_v39 = vpop.permute.xlu0 %1506 }
 0x1e5   : > { %1756 = vst.msk [vmem:[#allocation2 + $0x30] sm:$0xff] %vm1749_vm9, %v1666_v20 }
 0x1e6   : > { %1580 = vst.msk [vmem:[#allocation2 + $0xb8] sm:$0xff] %vm1556_vm8, %v1507_v39  ;;  %1709 = vrot.lane.b32.xlu1 %v2436_v13, %s2614_s29 }
 0x1e7   : > { %1677 = vrot.lane.b32.xlu0 %v2420_v54, %s2614_s29 }
 0x1e8   : > { %v931_v19 = vpop.permute.xlu1 %930  ;;  %v1698_v5 = vpop.permute.xlu0 %1697 }
 0x1e9   : > { %1002 = vst.msk [vmem:[#allocation2 + $0xc8] sm:$0xff] %vm976_vm5, %v931_v19 }
 0x1ea   : > { %1772 = vst.msk [vmem:[#allocation2 + $0xb0] sm:$0xff] %vm1749_vm9, %v1698_v5  ;;  %942 = vrot.lane.b32.xlu1 %v2405_v24, %s2610_s21 }
 0x1eb   : > { %910 = vrot.lane.b32.xlu0 %v2389_v43, %s2610_s21 }
 0x1ec   : > { %v1122_v38 = vpop.permute.xlu1 %1121  ;;  %v1090_v36 = vpop.permute.xlu0 %1089  ;;  %v1788_v4 = vld [vmem:[#allocation2 + $0x30] sm:$0xff] }
 0x1ed   : > { %1194 = vst.msk [vmem:[#allocation2 + $0xc0] sm:$0xff] %vm1169_vm6, %v1122_v38  ;;  %1178 = vst.msk [vmem:[#allocation2 + $0x40] sm:$0xff] %vm1169_vm6, %v1090_v36  ;;  %2533 = vmatprep.mubr.msk.f32.mxu0 %vm1826_vm10, %v1788_v4 }
 0x1ee   : > { %1133 = vrot.lane.b32.xlu1 %v2436_v13, %s2611_s22 }
 0x1ef   : > { %1101 = vrot.lane.b32.xlu0 %v2420_v54, %s2611_s22 }
 0x1f0   : > { %v1700_v61 = vpop.permute.xlu1 %1699  ;;  %v1668_v62 = vpop.permute.xlu0 %1667 }
 0x1f1   : > { %v1804_v12 = vld [vmem:[#allocation2 + $0xb0] sm:$0xff]  ;;  %1773 = vst.msk [vmem:[#allocation2 + $0xb8] sm:$0xff] %vm1749_vm9, %v1700_v61  ;;  %1757 = vst.msk [vmem:[#allocation2 + $0x38] sm:$0xff] %vm1749_vm9, %v1668_v62 }
 0x1f2   : > { %2557 = vmatprep.mubr.msk.f32.mxu1 %vm1826_vm10, %v1804_v12  ;;  %1711 = vrot.lane.b32.xlu1 %v2437_v47, %s2614_s29 }
 0x1f3   : > { %1679 = vrot.lane.b32.xlu0 %v2421_v37, %s2614_s29 }
 0x1f4   : > { %v1124_v16 = vpop.permute.xlu1 %1123  ;;  %v1092_v46 = vpop.permute.xlu0 %1091 }
 0x1f5   : > { %1195 = vst.msk [vmem:[#allocation2 + $0xc8] sm:$0xff] %vm1169_vm6, %v1124_v16  ;;  %1179 = vst.msk [vmem:[#allocation2 + $0x48] sm:$0xff] %vm1169_vm6, %v1092_v46 }
 0x1f6   : > { %1135 = vrot.lane.b32.xlu1 %v2437_v47, %s2611_s22 }
 0x1f7   : > { %1103 = vrot.lane.b32.xlu0 %v2421_v37, %s2611_s22 }
 0x1f8   : > { %v1316_v3 = vpop.permute.xlu1 %1315  ;;  %v1789_v29 = vld [vmem:[#allocation2 + $0x38] sm:$0xff] }
 0x1f9   : > { %v1284_v27 = vpop.permute.xlu0 %1283  ;;  %v1805_v48 = vld [vmem:[#allocation2 + $0xb8] sm:$0xff]  ;;  %1388 = vst.msk [vmem:[#allocation2 + $0xc0] sm:$0xff] %vm1363_vm7, %v1316_v3  ;;  %2534 = vmatmul.mubr.msk.f32.gmra.mxu0 %vm1826_vm10, %v1789_v29 }
 0x1fa   : > { %1372 = vst.msk [vmem:[#allocation2 + $0x40] sm:$0xff] %vm1363_vm7, %v1284_v27  ;;  %2558 = vmatmul.mubr.msk.f32.gmra.mxu1 %vm1826_vm10, %v1805_v48  ;;  %1327 = vrot.lane.b32.xlu1 %v2374_v63, %s2612_s23  ;;  %v3652_v63 = vld [vmem:[%s3796_s2] ss:$0 sm:$0xff] }
 0x1fb   : > { %1295 = vrot.lane.b32.xlu0 %v2358_v49, %s2612_s23 }
 0x1fc   : > { %v1318_v59 = vpop.permute.xlu1 %1317 }
 0x1fd   : > { %v1286_v60 = vpop.permute.xlu0 %1285  ;;  %1389 = vst.msk [vmem:[#allocation2 + $0xc8] sm:$0xff] %vm1363_vm7, %v1318_v59 }
 0x1fe   : > { %1373 = vst.msk [vmem:[#allocation2 + $0x48] sm:$0xff] %vm1363_vm7, %v1286_v60  ;;  %1329 = vrot.lane.b32.xlu1 %v2375_v21, %s2612_s23 }
 0x1ff   : > { %1297 = vrot.lane.b32.xlu0 %v2359_v26, %s2612_s23 }
 0x200   : > { %v1509_v58 = vpop.permute.xlu1 %1508 }
 0x201   : > { %v1477_v23 = vpop.permute.xlu0 %1476  ;;  %1581 = vst.msk [vmem:[#allocation2 + $0xc0] sm:$0xff] %vm1556_vm8, %v1509_v58 }
 0x202   : > { %1565 = vst.msk [vmem:[#allocation2 + $0x40] sm:$0xff] %vm1556_vm8, %v1477_v23  ;;  %1520 = vrot.lane.b32.xlu1 %v2406_v1, %s2613_s24 }
 0x203   : > { %1488 = vrot.lane.b32.xlu0 %v2390_v18, %s2613_s24 }
 0x204   : > { %v1479_v22 = vpop.permute.xlu1 %1478 }
 0x205   : > { %v933_v40 = vpop.permute.xlu0 %932  ;;  %1566 = vst.msk [vmem:[#allocation2 + $0x48] sm:$0xff] %vm1556_vm8, %v1479_v22 }
 0x206   : > { %1003 = vst.msk [vmem:[#allocation2 + $0xd0] sm:$0xff] %vm976_vm5, %v933_v40  ;;  %1522 = vrot.lane.b32.xlu1 %v2407_v41, %s2613_s24 }
 0x207   : > { %1490 = vrot.lane.b32.xlu0 %v2391_v50, %s2613_s24 }
 0x208   : > { %v1670_v30 = vpop.permute.xlu1 %1669 }
 0x209   : > { %v1511_v56 = vpop.permute.xlu0 %1510  ;;  %1758 = vst.msk [vmem:[#allocation2 + $0x40] sm:$0xff] %vm1749_vm9, %v1670_v30 }
 0x20a   : > { %1582 = vst.msk [vmem:[#allocation2 + $0xc8] sm:$0xff] %vm1556_vm8, %v1511_v56  ;;  %1713 = vrot.lane.b32.xlu1 %v2438_v7, %s2614_s29 }
 0x20b   : > { %1681 = vrot.lane.b32.xlu0 %v2422_v51, %s2614_s29 }
 0x20c   : > { %v935_v28 = vpop.permute.xlu1 %934 }
 0x20d   : > { %v1702_v31 = vpop.permute.xlu0 %1701  ;;  %1004 = vst.msk [vmem:[#allocation2 + $0xd8] sm:$0xff] %vm976_vm5, %v935_v28 }
 0x20e   : > { %1774 = vst.msk [vmem:[#allocation2 + $0xc0] sm:$0xff] %vm1749_vm9, %v1702_v31  ;;  %1715 = vrot.lane.b32.xlu1 %v2439_v6, %s2614_s29 }
 0x20f   : > { %1683 = vrot.lane.b32.xlu0 %v2423_v57, %s2614_s29 }
 0x210   : > { %v1126_v0 = vpop.permute.xlu1 %1125  ;;  %v1790_v32 = vld [vmem:[#allocation2 + $0x40] sm:$0xff] }
 0x211   : > { %v1094_v2 = vpop.permute.xlu0 %1093  ;;  %1196 = vst.msk [vmem:[#allocation2 + $0xd0] sm:$0xff] %vm1169_vm6, %v1126_v0  ;;  %2536 = vmatprep.mubr.msk.f32.mxu0 %vm1826_vm10, %v1790_v32 }
 0x212   : > { %1180 = vst.msk [vmem:[#allocation2 + $0x50] sm:$0xff] %vm1169_vm6, %v1094_v2 }
 0x214   : > { %v1704_v33 = vpop.permute.xlu1 %1703 }
 0x215   : > { %v1672_v34 = vpop.permute.xlu0 %1671  ;;  %v1806_v35 = vld [vmem:[#allocation2 + $0xc0] sm:$0xff]  ;;  %1775 = vst.msk [vmem:[#allocation2 + $0xc8] sm:$0xff] %vm1749_vm9, %v1704_v33 }
 0x216   : > { %1759 = vst.msk [vmem:[#allocation2 + $0x48] sm:$0xff] %vm1749_vm9, %v1672_v34  ;;  %2560 = vmatprep.mubr.msk.f32.mxu1 %vm1826_vm10, %v1806_v35 }
 0x218   : > { %v1128_v8 = vpop.permute.xlu1 %1127 }
 0x219   : > { %v1096_v9 = vpop.permute.xlu0 %1095  ;;  %1197 = vst.msk [vmem:[#allocation2 + $0xd8] sm:$0xff] %vm1169_vm6, %v1128_v8 }
 0x21a   : > { %1181 = vst.msk [vmem:[#allocation2 + $0x58] sm:$0xff] %vm1169_vm6, %v1096_v9 }
 0x21c   : > { %v1320_v53 = vpop.permute.xlu1 %1319  ;;  %v1807_v11 = vld [vmem:[#allocation2 + $0xc8] sm:$0xff] }
 0x21d   : > { %v1288_v10 = vpop.permute.xlu0 %1287  ;;  %v1791_v52 = vld [vmem:[#allocation2 + $0x48] sm:$0xff]  ;;  %1390 = vst.msk [vmem:[#allocation2 + $0xd0] sm:$0xff] %vm1363_vm7, %v1320_v53  ;;  %2561 = vmatmul.mubr.msk.f32.gmra.mxu1 %vm1826_vm10, %v1807_v11 }
 0x21e   : > { %1374 = vst.msk [vmem:[#allocation2 + $0x50] sm:$0xff] %vm1363_vm7, %v1288_v10  ;;  %2537 = vmatmul.mubr.msk.f32.gmra.mxu0 %vm1826_vm10, %v1791_v52 }
 0x220   : > { %v1322_v45 = vpop.permute.xlu1 %1321 }
 0x221   : > { %v1290_v14 = vpop.permute.xlu0 %1289  ;;  %1391 = vst.msk [vmem:[#allocation2 + $0xd8] sm:$0xff] %vm1363_vm7, %v1322_v45 }
 0x222   : > { %1375 = vst.msk [vmem:[#allocation2 + $0x58] sm:$0xff] %vm1363_vm7, %v1290_v14 }
 0x224   : > { %v1513_v25 = vpop.permute.xlu1 %1512 }
 0x225   : > { %v1481_v15 = vpop.permute.xlu0 %1480  ;;  %1583 = vst.msk [vmem:[#allocation2 + $0xd0] sm:$0xff] %vm1556_vm8, %v1513_v25 }
 0x226   : > { %1567 = vst.msk [vmem:[#allocation2 + $0x50] sm:$0xff] %vm1556_vm8, %v1481_v15 }
 0x228   : > { %v937_v44 = vpop.permute.xlu1 %936 }
 0x229   : > { %v905_v42 = vpop.permute.xlu0 %904  ;;  %1005 = vst.msk [vmem:[#allocation2 + $0xe0] sm:$0xff] %vm976_vm5, %v937_v44 }
 0x22a   : > { %989 = vst.msk [vmem:[#allocation2 + $0x60] sm:$0xff] %vm976_vm5, %v905_v42 }
 0x22c   : > { %v1515_v24 = vpop.permute.xlu1 %1514 }
 0x22d   : > { %v1483_v43 = vpop.permute.xlu0 %1482  ;;  %1584 = vst.msk [vmem:[#allocation2 + $0xd8] sm:$0xff] %vm1556_vm8, %v1515_v24 }
 0x22e   : > { %1568 = vst.msk [vmem:[#allocation2 + $0x58] sm:$0xff] %vm1556_vm8, %v1483_v43 }
 0x230   : > { %v1706_v17 = vpop.permute.xlu1 %1705 }
 0x231   : > { %v1674_v55 = vpop.permute.xlu0 %1673  ;;  %1776 = vst.msk [vmem:[#allocation2 + $0xd0] sm:$0xff] %vm1749_vm9, %v1706_v17 }
 0x232   : > { %1760 = vst.msk [vmem:[#allocation2 + $0x50] sm:$0xff] %vm1749_vm9, %v1674_v55 }
 0x234   : > { %v939_v13 = vpop.permute.xlu1 %938 }
 0x235   : > { %v907_v54 = vpop.permute.xlu0 %906  ;;  %1006 = vst.msk [vmem:[#allocation2 + $0xe8] sm:$0xff] %vm976_vm5, %v939_v13 }
 0x236   : > { %990 = vst.msk [vmem:[#allocation2 + $0x68] sm:$0xff] %vm976_vm5, %v907_v54 }
 0x238   : > { %v1130_v20 = vpop.permute.xlu1 %1129  ;;  %v1808_v5 = vld [vmem:[#allocation2 + $0xd0] sm:$0xff] }
 0x239   : > { %v1098_v39 = vpop.permute.xlu0 %1097  ;;  %v1792_v19 = vld [vmem:[#allocation2 + $0x50] sm:$0xff]  ;;  %1198 = vst.msk [vmem:[#allocation2 + $0xe0] sm:$0xff] %vm1169_vm6, %v1130_v20  ;;  %2563 = vmatprep.mubr.msk.f32.mxu1 %vm1826_vm10, %v1808_v5 }
 0x23a   : > { %1182 = vst.msk [vmem:[#allocation2 + $0x60] sm:$0xff] %vm1169_vm6, %v1098_v39  ;;  %2539 = vmatprep.mubr.msk.f32.mxu0 %vm1826_vm10, %v1792_v19 }
 0x23c   : > { %v1708_v38 = vpop.permute.xlu1 %1707 }
 0x23d   : > { %v1676_v36 = vpop.permute.xlu0 %1675  ;;  %1777 = vst.msk [vmem:[#allocation2 + $0xd8] sm:$0xff] %vm1749_vm9, %v1708_v38 }
 0x23e   : > { %1761 = vst.msk [vmem:[#allocation2 + $0x58] sm:$0xff] %vm1749_vm9, %v1676_v36 }
 0x240   : > { %v1132_v4 = vpop.permute.xlu1 %1131 }
 0x241   : > { %v1100_v47 = vpop.permute.xlu0 %1099  ;;  %1199 = vst.msk [vmem:[#allocation2 + $0xe8] sm:$0xff] %vm1169_vm6, %v1132_v4 }
 0x242   : > { %1183 = vst.msk [vmem:[#allocation2 + $0x68] sm:$0xff] %vm1169_vm6, %v1100_v47 }
 0x244   : > { %v1324_v37 = vpop.permute.xlu1 %1323  ;;  %v1809_v12 = vld [vmem:[#allocation2 + $0xd8] sm:$0xff] }
 0x245   : > { %v1292_v61 = vpop.permute.xlu0 %1291  ;;  %v1793_v62 = vld [vmem:[#allocation2 + $0x58] sm:$0xff]  ;;  %1392 = vst.msk [vmem:[#allocation2 + $0xe0] sm:$0xff] %vm1363_vm7, %v1324_v37  ;;  %2564 = vmatmul.mubr.msk.f32.gmra.mxu1 %vm1826_vm10, %v1809_v12 }
 0x246   : > { %1376 = vst.msk [vmem:[#allocation2 + $0x60] sm:$0xff] %vm1363_vm7, %v1292_v61  ;;  %2540 = vmatmul.mubr.msk.f32.gmra.mxu0 %vm1826_vm10, %v1793_v62 }
 0x248   : > { %v1326_v16 = vpop.permute.xlu1 %1325 }
 0x249   : > { %v1294_v46 = vpop.permute.xlu0 %1293  ;;  %1393 = vst.msk [vmem:[#allocation2 + $0xe8] sm:$0xff] %vm1363_vm7, %v1326_v16 }
 0x24a   : > { %1377 = vst.msk [vmem:[#allocation2 + $0x68] sm:$0xff] %vm1363_vm7, %v1294_v46 }
 0x24c   : > { %v1517_v49 = vpop.permute.xlu1 %1516 }
 0x24d   : > { %v1485_v3 = vpop.permute.xlu0 %1484  ;;  %1585 = vst.msk [vmem:[#allocation2 + $0xe0] sm:$0xff] %vm1556_vm8, %v1517_v49  ;;  %v2526_v27 = vpop.f32.mrf.mxu0 }
 0x24e   : > { %1569 = vst.msk [vmem:[#allocation2 + $0x60] sm:$0xff] %vm1556_vm8, %v1485_v3  ;;  %v2550_v29 = vpop.f32.mrf.mxu1  ;;  %v1999_v48 = vadd.f32 %v2526_v27, %v3652_v63 }
 0x24f   : > { %v2079_v21 = vadd.f32 %v2550_v29, %v3652_v63  ;;  %v1993_v26 = vpop.f32.mrf.mxu0 }
 0x250   : > { %v2073_v59 = vpop.f32.mrf.mxu1  ;;  %2154 = vst.msk [vmem:[%s3659_s16 + $0x8] sm:$0xff] %vm2152_vm11, %v1999_v48  ;;  %v1994_v60 = vadd.f32 %v3652_v63, %v1993_v26  ;;  %v941_v18 = vpop.permute.xlu1 %940 }
 0x251   : > { %2170 = vst.msk [vmem:[%s3659_s16 + $0x88] sm:$0xff] %vm2152_vm11, %v2079_v21  ;;  %v2074_v1 = vadd.f32 %v3652_v63, %v2073_v59  ;;  %v909_v58 = vpop.permute.xlu0 %908 }
 0x252   : > { %1007 = vst.msk [vmem:[#allocation2 + $0xf0] sm:$0xff] %vm976_vm5, %v941_v18  ;;  %991 = vst.msk [vmem:[#allocation2 + $0x70] sm:$0xff] %vm976_vm5, %v909_v58 }
 0x253   : > { %2153 = vst.msk [vmem:[%s3659_s16] sm:$0xff] %vm2152_vm11, %v1994_v60  ;;  %2169 = vst.msk [vmem:[%s3659_s16 + $0x80] sm:$0xff] %vm2152_vm11, %v2074_v1 }
 0x254   : > { %v1519_v23 = vpop.permute.xlu1 %1518 }
 0x255   : > { %v1487_v41 = vpop.permute.xlu0 %1486  ;;  %1586 = vst.msk [vmem:[#allocation2 + $0xe8] sm:$0xff] %vm1556_vm8, %v1519_v23 }
 0x256   : > { %1570 = vst.msk [vmem:[#allocation2 + $0x68] sm:$0xff] %vm1556_vm8, %v1487_v41 }
 0x258   : > { %v1710_v50 = vpop.permute.xlu1 %1709 }
 0x259   : > { %v1678_v22 = vpop.permute.xlu0 %1677  ;;  %1778 = vst.msk [vmem:[#allocation2 + $0xe0] sm:$0xff] %vm1749_vm9, %v1710_v50 }
 0x25a   : > { %1762 = vst.msk [vmem:[#allocation2 + $0x60] sm:$0xff] %vm1749_vm9, %v1678_v22 }
 0x25c   : > { %v943_v40 = vpop.permute.xlu1 %942 }
 0x25d   : > { %v911_v7 = vpop.permute.xlu0 %910  ;;  %1008 = vst.msk [vmem:[#allocation2 + $0xf8] sm:$0xff] %vm976_vm5, %v943_v40 }
 0x25e   : > { %992 = vst.msk [vmem:[#allocation2 + $0x78] sm:$0xff] %vm976_vm5, %v911_v7 }
 0x260   : > { %v1134_v51 = vpop.permute.xlu1 %1133  ;;  %v1810_v6 = vld [vmem:[#allocation2 + $0xe0] sm:$0xff] }
 0x261   : > { %v1102_v30 = vpop.permute.xlu0 %1101  ;;  %v1794_v56 = vld [vmem:[#allocation2 + $0x60] sm:$0xff]  ;;  %1200 = vst.msk [vmem:[#allocation2 + $0xf0] sm:$0xff] %vm1169_vm6, %v1134_v51  ;;  %2566 = vmatprep.mubr.msk.f32.mxu1 %vm1826_vm10, %v1810_v6 }
 0x262   : > { %1184 = vst.msk [vmem:[#allocation2 + $0x70] sm:$0xff] %vm1169_vm6, %v1102_v30  ;;  %2542 = vmatprep.mubr.msk.f32.mxu0 %vm1826_vm10, %v1794_v56 }
 0x264   : > { %v1712_v57 = vpop.permute.xlu1 %1711 }
 0x265   : > { %v1680_v28 = vpop.permute.xlu0 %1679  ;;  %1779 = vst.msk [vmem:[#allocation2 + $0xe8] sm:$0xff] %vm1749_vm9, %v1712_v57 }
 0x266   : > { %1763 = vst.msk [vmem:[#allocation2 + $0x68] sm:$0xff] %vm1749_vm9, %v1680_v28 }
 0x268   : > { %v1136_v31 = vpop.permute.xlu1 %1135 }
 0x269   : > { %v1104_v0 = vpop.permute.xlu0 %1103  ;;  %1201 = vst.msk [vmem:[#allocation2 + $0xf8] sm:$0xff] %vm1169_vm6, %v1136_v31 }
 0x26a   : > { %1185 = vst.msk [vmem:[#allocation2 + $0x78] sm:$0xff] %vm1169_vm6, %v1104_v0 }
 0x26c   : > { %v1328_v2 = vpop.permute.xlu1 %1327  ;;  %v1811_v34 = vld [vmem:[#allocation2 + $0xe8] sm:$0xff] }
 0x26d   : > { %v1296_v32 = vpop.permute.xlu0 %1295  ;;  %v1795_v33 = vld [vmem:[#allocation2 + $0x68] sm:$0xff]  ;;  %1394 = vst.msk [vmem:[#allocation2 + $0xf0] sm:$0xff] %vm1363_vm7, %v1328_v2  ;;  %2567 = vmatmul.mubr.msk.f32.gmra.mxu1 %vm1826_vm10, %v1811_v34 }
 0x26e   : > { %1378 = vst.msk [vmem:[#allocation2 + $0x70] sm:$0xff] %vm1363_vm7, %v1296_v32  ;;  %2543 = vmatmul.mubr.msk.f32.gmra.mxu0 %vm1826_vm10, %v1795_v33 }
 0x270   : > { %v1330_v35 = vpop.permute.xlu1 %1329 }
 0x271   : > { %v1298_v8 = vpop.permute.xlu0 %1297  ;;  %1395 = vst.msk [vmem:[#allocation2 + $0xf8] sm:$0xff] %vm1363_vm7, %v1330_v35  ;;  %v2529_v9 = vpop.f32.mrf.mxu0 }
 0x272   : > { %1379 = vst.msk [vmem:[#allocation2 + $0x78] sm:$0xff] %vm1363_vm7, %v1298_v8  ;;  %v2553_v53 = vpop.f32.mrf.mxu1  ;;  %v2009_v10 = vadd.f32 %v2529_v9, %v3652_v63 }
 0x273   : > { %v2089_v52 = vadd.f32 %v2553_v53, %v3652_v63  ;;  %v2003_v11 = vpop.f32.mrf.mxu0 }
 0x274   : > { %v2083_v45 = vpop.f32.mrf.mxu1  ;;  %2156 = vst.msk [vmem:[%s3659_s16 + $0x18] sm:$0xff] %vm2152_vm11, %v2009_v10  ;;  %v2004_v14 = vadd.f32 %v3652_v63, %v2003_v11  ;;  %v1521_v15 = vpop.permute.xlu1 %1520 }
 0x275   : > { %2172 = vst.msk [vmem:[%s3659_s16 + $0x98] sm:$0xff] %vm2152_vm11, %v2089_v52  ;;  %v2084_v25 = vadd.f32 %v3652_v63, %v2083_v45  ;;  %v1489_v44 = vpop.permute.xlu0 %1488 }
 0x276   : > { %1587 = vst.msk [vmem:[#allocation2 + $0xf0] sm:$0xff] %vm1556_vm8, %v1521_v15  ;;  %1571 = vst.msk [vmem:[#allocation2 + $0x70] sm:$0xff] %vm1556_vm8, %v1489_v44 }
 0x277   : > { %2155 = vst.msk [vmem:[%s3659_s16 + $0x10] sm:$0xff] %vm2152_vm11, %v2004_v14  ;;  %2171 = vst.msk [vmem:[%s3659_s16 + $0x90] sm:$0xff] %vm2152_vm11, %v2084_v25 }
 0x278   : > { %v1523_v42 = vpop.permute.xlu1 %1522 }
 0x279   : > { %v1491_v24 = vpop.permute.xlu0 %1490  ;;  %1588 = vst.msk [vmem:[#allocation2 + $0xf8] sm:$0xff] %vm1556_vm8, %v1523_v42 }
 0x27a   : > { %1572 = vst.msk [vmem:[#allocation2 + $0x78] sm:$0xff] %vm1556_vm8, %v1491_v24 }
 0x27c   : > { %v1714_v43 = vpop.permute.xlu1 %1713 }
 0x27d   : > { %v1682_v17 = vpop.permute.xlu0 %1681  ;;  %1780 = vst.msk [vmem:[#allocation2 + $0xf0] sm:$0xff] %vm1749_vm9, %v1714_v43 }
 0x27e   : > { %1764 = vst.msk [vmem:[#allocation2 + $0x70] sm:$0xff] %vm1749_vm9, %v1682_v17 }
 0x280   : > { %v1716_v55 = vpop.permute.xlu1 %1715 }
 0x281   : > { %v1684_v13 = vpop.permute.xlu0 %1683  ;;  %1781 = vst.msk [vmem:[#allocation2 + $0xf8] sm:$0xff] %vm1749_vm9, %v1716_v55 }
 0x282   : > { %1765 = vst.msk [vmem:[#allocation2 + $0x78] sm:$0xff] %vm1749_vm9, %v1684_v13 }
 0x284   : > { %v1812_v20 = vld [vmem:[#allocation2 + $0xf0] sm:$0xff] }
 0x285   : > { %v1796_v54 = vld [vmem:[#allocation2 + $0x70] sm:$0xff]  ;;  %2569 = vmatprep.mubr.msk.f32.mxu1 %vm1826_vm10, %v1812_v20 }
 0x286   : > { %2545 = vmatprep.mubr.msk.f32.mxu0 %vm1826_vm10, %v1796_v54 }
 0x288   : > { %v1813_v19 = vld [vmem:[#allocation2 + $0xf8] sm:$0xff] }
 0x289   : > { %v1797_v39 = vld [vmem:[#allocation2 + $0x78] sm:$0xff]  ;;  %2570 = vmatmul.mubr.msk.f32.gmra.mxu1 %vm1826_vm10, %v1813_v19 }
 0x28a   : > { %2546 = vmatmul.mubr.msk.f32.gmra.mxu0 %vm1826_vm10, %v1797_v39 }
 0x295   : > { %v2532_v5 = vpop.f32.mrf.mxu0 }
 0x296   : > { %v2556_v38 = vpop.f32.mrf.mxu1  ;;  %v2019_v36 = vadd.f32 %v2532_v5, %v3652_v63 }
 0x297   : > { %v2099_v4 = vadd.f32 %v2556_v38, %v3652_v63  ;;  %v2013_v47 = vpop.f32.mrf.mxu0 }
 0x298   : > { %v2093_v37 = vpop.f32.mrf.mxu1  ;;  %2158 = vst.msk [vmem:[%s3659_s16 + $0x28] sm:$0xff] %vm2152_vm11, %v2019_v36  ;;  %v2014_v61 = vadd.f32 %v3652_v63, %v2013_v47 }
 0x299   : > { %2174 = vst.msk [vmem:[%s3659_s16 + $0xa8] sm:$0xff] %vm2152_vm11, %v2099_v4  ;;  %v2094_v62 = vadd.f32 %v3652_v63, %v2093_v37 }
 0x29a   : > { %2157 = vst.msk [vmem:[%s3659_s16 + $0x20] sm:$0xff] %vm2152_vm11, %v2014_v61 }
 0x29b   : > { %2173 = vst.msk [vmem:[%s3659_s16 + $0xa0] sm:$0xff] %vm2152_vm11, %v2094_v62 }
 0x2b9   : > { %v2535_v12 = vpop.f32.mrf.mxu0 }
 0x2ba   : > { %v2559_v16 = vpop.f32.mrf.mxu1  ;;  %v2029_v46 = vadd.f32 %v2535_v12, %v3652_v63 }
 0x2bb   : > { %v2109_v49 = vadd.f32 %v2559_v16, %v3652_v63  ;;  %v2023_v3 = vpop.f32.mrf.mxu0 }
 0x2bc   : > { %v2103_v27 = vpop.f32.mrf.mxu1  ;;  %2160 = vst.msk [vmem:[%s3659_s16 + $0x38] sm:$0xff] %vm2152_vm11, %v2029_v46  ;;  %v2024_v29 = vadd.f32 %v3652_v63, %v2023_v3 }
 0x2bd   : > { %2176 = vst.msk [vmem:[%s3659_s16 + $0xb8] sm:$0xff] %vm2152_vm11, %v2109_v49  ;;  %v2104_v48 = vadd.f32 %v3652_v63, %v2103_v27 }
 0x2be   : > { %2159 = vst.msk [vmem:[%s3659_s16 + $0x30] sm:$0xff] %vm2152_vm11, %v2024_v29 }
 0x2bf   : > { %2175 = vst.msk [vmem:[%s3659_s16 + $0xb0] sm:$0xff] %vm2152_vm11, %v2104_v48 }
 0x2dd   : > { %v2562_v26 = vpop.f32.mrf.mxu1 }
 0x2de   : > { %v2538_v21 = vpop.f32.mrf.mxu0  ;;  %v2119_v60 = vadd.f32 %v2562_v26, %v3652_v63 }
 0x2df   : > { %v2039_v59 = vadd.f32 %v2538_v21, %v3652_v63  ;;  %v2113_v18 = vpop.f32.mrf.mxu1 }
 0x2e0   : > { %v2033_v1 = vpop.f32.mrf.mxu0  ;;  %2178 = vst.msk [vmem:[%s3659_s16 + $0xc8] sm:$0xff] %vm2152_vm11, %v2119_v60  ;;  %v2114_v23 = vadd.f32 %v3652_v63, %v2113_v18 }
 0x2e1   : > { %2162 = vst.msk [vmem:[%s3659_s16 + $0x48] sm:$0xff] %vm2152_vm11, %v2039_v59  ;;  %v2034_v58 = vadd.f32 %v3652_v63, %v2033_v1 }
 0x2e2   : > { %2177 = vst.msk [vmem:[%s3659_s16 + $0xc0] sm:$0xff] %vm2152_vm11, %v2114_v23 }
 0x2e3   : > { %2161 = vst.msk [vmem:[%s3659_s16 + $0x40] sm:$0xff] %vm2152_vm11, %v2034_v58 }
 0x305   : > { %v2565_v50 = vpop.f32.mrf.mxu1 }
 0x306   : > { %v2541_v41 = vpop.f32.mrf.mxu0  ;;  %v2129_v40 = vadd.f32 %v2565_v50, %v3652_v63 }
 0x307   : > { %v2049_v22 = vadd.f32 %v2541_v41, %v3652_v63  ;;  %v2123_v51 = vpop.f32.mrf.mxu1 }
 0x308   : > { %v2043_v7 = vpop.f32.mrf.mxu0  ;;  %2180 = vst.msk [vmem:[%s3659_s16 + $0xd8] sm:$0xff] %vm2152_vm11, %v2129_v40  ;;  %v2124_v56 = vadd.f32 %v3652_v63, %v2123_v51 }
 0x309   : > { %2164 = vst.msk [vmem:[%s3659_s16 + $0x58] sm:$0xff] %vm2152_vm11, %v2049_v22  ;;  %v2044_v30 = vadd.f32 %v3652_v63, %v2043_v7 }
 0x30a   : > { %2179 = vst.msk [vmem:[%s3659_s16 + $0xd0] sm:$0xff] %vm2152_vm11, %v2124_v56 }
 0x30b   : > { %2163 = vst.msk [vmem:[%s3659_s16 + $0x50] sm:$0xff] %vm2152_vm11, %v2044_v30 }
 0x32d   : > { %v2568_v57 = vpop.f32.mrf.mxu1 }
 0x32e   : > { %v2544_v6 = vpop.f32.mrf.mxu0  ;;  %v2139_v31 = vadd.f32 %v2568_v57, %v3652_v63 }
 0x32f   : > { %v2059_v28 = vadd.f32 %v2544_v6, %v3652_v63  ;;  %v2133_v2 = vpop.f32.mrf.mxu1 }
 0x330   : > { %v2053_v0 = vpop.f32.mrf.mxu0  ;;  %2182 = vst.msk [vmem:[%s3659_s16 + $0xe8] sm:$0xff] %vm2152_vm11, %v2139_v31  ;;  %v2134_v33 = vadd.f32 %v3652_v63, %v2133_v2 }
 0x331   : > { %2166 = vst.msk [vmem:[%s3659_s16 + $0x68] sm:$0xff] %vm2152_vm11, %v2059_v28  ;;  %v2054_v32 = vadd.f32 %v3652_v63, %v2053_v0 }
 0x332   : > { %2181 = vst.msk [vmem:[%s3659_s16 + $0xe0] sm:$0xff] %vm2152_vm11, %v2134_v33 }
 0x333   : > { %2165 = vst.msk [vmem:[%s3659_s16 + $0x60] sm:$0xff] %vm2152_vm11, %v2054_v32 }
 0x349   : > { %v2571_v35 = vpop.f32.mrf.mxu1 }
 0x34a   : > { %v2547_v34 = vpop.f32.mrf.mxu0  ;;  %v2149_v9 = vadd.f32 %v2571_v35, %v3652_v63 }
 0x34b   : > { %v2069_v8 = vadd.f32 %v2547_v34, %v3652_v63  ;;  %v2143_v10 = vpop.f32.mrf.mxu1 }
 0x34c   : > { %v2063_v53 = vpop.f32.mrf.mxu0  ;;  %2184 = vst.msk [vmem:[%s3659_s16 + $0xf8] sm:$0xff] %vm2152_vm11, %v2149_v9  ;;  %v2144_v11 = vadd.f32 %v3652_v63, %v2143_v10 }
 0x34d   : > { %2168 = vst.msk [vmem:[%s3659_s16 + $0x78] sm:$0xff] %vm2152_vm11, %v2069_v8  ;;  %v2064_v52 = vadd.f32 %v3652_v63, %v2063_v53 }
 0x34e   : > { %2183 = vst.msk [vmem:[%s3659_s16 + $0xf0] sm:$0xff] %vm2152_vm11, %v2144_v11 }
 0x34f   : > { %2167 = vst.msk [vmem:[%s3659_s16 + $0x70] sm:$0xff] %vm2152_vm11, %v2064_v52 }
 0x350 PF: > { %s13_s12 = sadd.s32 1, %s2605_s12  }
 0x351   : > { %p10_p4 = scmp.ge.s32.totalorder %s13_s12, 4  }
 0x353   :  { %12 = sbr.rel (!%p10_p4) target bundleno = 1 (0x1), region = 64 }

</bundles_post_ra>
